<compile_context>
chip_gen: v7x
topology: tpu7x:2x2x1
jax: 0.10.0
libtpu: 0.0.40
codegen_flags: <defaults>
</compile_context>

<pallas_src>
import jax
import jax.numpy as jnp
from jax.experimental import pallas as pl
from jax.experimental.pallas import tpu as pltpu

EPS = 1e-7


def _round_up(x, m):
    return (x + m - 1) // m * m


def _vmem_capacity_bytes():
    try:
        return int(pltpu.get_tpu_info().vmem_capacity_bytes)
    except Exception:
        return 64 << 20  # v7x per-TC VMEM — smallest of current generations, safe default


def _sublayer_connection_kernel(x_ref, a_ref, b_ref, w_ref, bias_ref,
                                out_ref, aux_ref):
    """One row-tile: fused LayerNorm -> linear sublayer (MXU) -> residual add."""
    x = x_ref[...].astype(jnp.float32)                        # (rt, D) f32
    d = x.shape[-1]

    # ---- LayerNorm (torch.std is unbiased: divide by D-1; eps added to std) ----
    mean = jnp.mean(x, axis=-1, keepdims=True)
    centered = x - mean
    var = jnp.sum(centered * centered, axis=-1, keepdims=True) * (1.0 / (d - 1))
    std = jnp.sqrt(var)
    # Per-row (rt, 1) reciprocal on the EUP (vrcp has its own VLIW slot -> ~free).
    # NOTE: zero-padded rows give std=0 -> inv ~ 1/eps, but it multiplies centered==0,
    # so keep this (centered * inv) ordering if refactoring.
    inv = pl.reciprocal(std + EPS, approx=True)
    h = a_ref[...] * (centered * inv) + b_ref[...]             # (rt, D) f32

    # aux output (= normalized activations) written in bf16 to halve its HBM traffic.
    aux_ref[...] = h.astype(aux_ref.dtype)

    # ---- deterministic "sublayer": linear on the MXU (bf16 in, f32 accumulate) ----
    y = jnp.dot(h.astype(w_ref.dtype), w_ref[...],
                preferred_element_type=jnp.float32) + bias_ref[...]

    # ---- residual (+ dropout in eval mode == identity) ----
    # Re-read x_ref here instead of carrying the f32 x tile across the matmul
    # (shortens live ranges; re-read from VMEM is a cheap vld).
    # TODO(synk): training-mode dropout (stochastic mask) not implemented; eval semantics.
    out_ref[...] = (x_ref[...].astype(jnp.float32) + y).astype(out_ref.dtype)


def sublayer_connection(x, a_2, b_2, w, bias, *, row_tile=1024):
    """x: [B, T, D]. Returns (x + sublayer(norm(x))[0], sublayer(norm(x))[1]).

    The residual output keeps x.dtype (pass bf16 activations for the fast path);
    the aux output is always bf16.
    """
    B, T, D = x.shape
    assert D > 1, "unbiased std (ddof=1) requires D > 1"
    N = B * T
    assert row_tile % 8 == 0

    # ---- row-tile choice ----
    rt = min(row_tile, _round_up(N, 8))
    # Keep the row grid length >= 2 whenever the data allows so v7x's two TensorCores
    # both get work (dimension_semantics=("parallel",) shards this axis across TCs).
    if N > 8 and _round_up(N, rt) // rt < 2:
        rt = _round_up((N + 1) // 2, 8)
    N_pad = _round_up(N, rt)

    x2 = x.reshape(N, D)
    if N_pad != N:
        # Zero-padded rows are harmless: std + eps > 0 and centered == 0; sliced off below.
        x2 = jnp.pad(x2, ((0, N_pad - N), (0, 0)))

    a2 = a_2.reshape(1, D).astype(jnp.float32)
    b2 = b_2.reshape(1, D).astype(jnp.float32)
    bias2 = bias.reshape(1, D).astype(jnp.float32)

    out_dtype = x.dtype
    aux_dtype = jnp.bfloat16

    itm_x = jnp.dtype(x.dtype).itemsize
    itm_o = jnp.dtype(out_dtype).itemsize
    itm_a = jnp.dtype(aux_dtype).itemsize
    itm_w = jnp.dtype(w.dtype).itemsize
    # Double-buffered x / out / aux streams + weight block (double-buffered by the default
    # pipeline even though its index is constant) + param rows + in-body f32 temporaries.
    needed = (2 * rt * D * (itm_x + itm_o + itm_a)
              + 2 * D * D * itm_w
              + 2 * 3 * D * 4
              + 6 * rt * D * 4)
    vmem_cap = int(0.75 * _vmem_capacity_bytes())     # generation-aware (v5e/v6e 128, v7x 64 MiB)
    assert needed <= vmem_cap, (
        f"tile footprint {needed} B exceeds VMEM budget {vmem_cap} B; reduce row_tile")
    vmem_limit = int(min(max(needed + (4 << 20), 32 << 20), vmem_cap))

    cost = pl.CostEstimate(
        flops=2 * N_pad * D * D + 10 * N_pad * D,
        transcendentals=2 * N_pad,
        bytes_accessed=(N_pad * D * (itm_x + itm_o + itm_a)
                        + D * D * itm_w + 3 * D * 4),
    )

    grid = (N_pad // rt,)
    out2, aux2 = pl.pallas_call(
        _sublayer_connection_kernel,
        out_shape=(jax.ShapeDtypeStruct((N_pad, D), out_dtype),
                   jax.ShapeDtypeStruct((N_pad, D), aux_dtype)),
        grid_spec=pltpu.PrefetchScalarGridSpec(
            num_scalar_prefetch=0,
            grid=grid,
            in_specs=[
                pl.BlockSpec((rt, D), lambda i: (i, 0)),     # x row tile
                pl.BlockSpec((1, D), lambda i: (0, 0)),      # a_2
                pl.BlockSpec((1, D), lambda i: (0, 0)),      # b_2
                pl.BlockSpec((D, D), lambda i: (0, 0)),      # W (bf16)
                pl.BlockSpec((1, D), lambda i: (0, 0)),      # bias
            ],
            out_specs=[
                pl.BlockSpec((rt, D), lambda i: (i, 0)),     # residual output (x.dtype)
                pl.BlockSpec((rt, D), lambda i: (i, 0)),     # aux = LayerNorm(x) (bf16)
            ],
        ),
        compiler_params=pltpu.CompilerParams(
            dimension_semantics=("parallel",),
            vmem_limit_bytes=vmem_limit),
        cost_estimate=cost,
    )(x2, a2, b2, w, bias2)

    return out2[:N].reshape(B, T, D), aux2[:N].reshape(B, T, D)


def _reference(x, a_2, b_2, w, bias):
    """Pure-JAX reference mirroring the PyTorch forward (f32 math, bf16 matmul inputs)."""
    x32 = x.astype(jnp.float32)
    mean = jnp.mean(x32, axis=-1, keepdims=True)
    std = jnp.std(x32, axis=-1, keepdims=True, ddof=1)
    h = a_2 * (x32 - mean) / (std + EPS) + b_2
    y = jnp.dot(h.astype(w.dtype), w, preferred_element_type=jnp.float32) + bias
    return x32 + y, h


if __name__ == "__main__":
    # Small but TPU-friendly demo shape: lane-dense D=128; N=512 rows, so the tile
    # chooser picks rt=256 and a row grid of length 2 (both v7x TensorCores busy).
    B, T, D = 2, 256, 128
    key = jax.random.PRNGKey(0)
    kx, kw, kb, ka, kb2 = jax.random.split(key, 5)

    # bf16 activations end-to-end (the performant path); math is f32 inside the kernel.
    x = jax.random.normal(kx, (B, T, D), dtype=jnp.float32).astype(jnp.bfloat16)

    # LayerNorm params (module inits ones/zeros; perturb slightly to exercise the math).
    a_2 = jnp.ones((D,), dtype=jnp.float32) + 0.1 * jax.random.normal(ka, (D,), jnp.float32)
    b_2 = 0.05 * jax.random.normal(kb2, (D,), dtype=jnp.float32)

    # Deterministic stand-in sublayer params; W stored/consumed in bf16 (MXU-native).
    w = (jax.random.normal(kw, (D, D), dtype=jnp.float32) * 0.05).astype(jnp.bfloat16)
    bias = jax.random.normal(kb, (D,), dtype=jnp.float32) * 0.01

    out, aux = sublayer_connection(x, a_2, b_2, w, bias)
    out = jax.block_until_ready(out)
    aux = jax.block_until_ready(aux)

    ref_out, ref_aux = _reference(x, a_2, b_2, w, bias)
    # Tolerances account for bf16 output storage + approx (EUP) reciprocal.
    assert jnp.allclose(out.astype(jnp.float32), ref_out, atol=4e-2, rtol=4e-2), \
        "residual output mismatch"
    assert jnp.allclose(aux.astype(jnp.float32), ref_aux, atol=4e-2, rtol=4e-2), \
        "aux (LayerNorm) mismatch"

    print("KERNEL_OK")
</pallas_src>

<mosaic_0001>
module attributes {stable_mosaic.version = 11 : i64} {
  func.func @_sublayer_connection_kernel(%arg0: i32, %arg1: memref<256x128xbf16, #tpu.memory_space<vmem>>, %arg2: memref<1x128xf32, #tpu.memory_space<vmem>>, %arg3: memref<1x128xf32, #tpu.memory_space<vmem>>, %arg4: memref<128x128xbf16, #tpu.memory_space<vmem>>, %arg5: memref<1x128xf32, #tpu.memory_space<vmem>>, %arg6: memref<256x128xbf16, #tpu.memory_space<vmem>>, %arg7: memref<256x128xbf16, #tpu.memory_space<vmem>>) attributes {dimension_semantics = [#tpu.dimension_semantics<parallel>], iteration_bounds = array<i64: 2>, scalar_prefetch = 0 : i64, scratch_operands = 0 : i64, tpu.core_type = #tpu.core_type<tc>, window_params = [{transform_indices = @transform_0, window_bounds = array<i64: 256, 128>}, {pipeline_mode = #tpu.pipeline_mode<synchronous>, transform_indices = @transform_1, window_bounds = array<i64: 1, 128>}, {pipeline_mode = #tpu.pipeline_mode<synchronous>, transform_indices = @transform_2, window_bounds = array<i64: 1, 128>}, {pipeline_mode = #tpu.pipeline_mode<synchronous>, transform_indices = @transform_3, window_bounds = array<i64: 128, 128>}, {pipeline_mode = #tpu.pipeline_mode<synchronous>, transform_indices = @transform_4, window_bounds = array<i64: 1, 128>}, {transform_indices = @transform_5, window_bounds = array<i64: 256, 128>}, {transform_indices = @transform_6, window_bounds = array<i64: 256, 128>}]} {
    %c0 = arith.constant 0 : index
    %c0_0 = arith.constant 0 : index
    %0 = vector.load %arg1[%c0, %c0_0] : memref<256x128xbf16, #tpu.memory_space<vmem>>, vector<256x128xbf16>
    %1 = arith.extf %0 : vector<256x128xbf16> to vector<256x128xf32>
    %cst = arith.constant dense<0.000000e+00> : vector<256xf32>
    %2 = vector.multi_reduction <add>, %1, %cst [1] : vector<256x128xf32> to vector<256xf32>
    %3 = vector.shape_cast %2 : vector<256xf32> to vector<256x1xf32>
    %cst_1 = arith.constant 1.280000e+02 : f32
    %4 = vector.broadcast %cst_1 : f32 to vector<256x1xf32>
    %5 = arith.divf %3, %4 : vector<256x1xf32>
    %6 = vector.broadcast %5 : vector<256x1xf32> to vector<256x128xf32>
    %7 = arith.subf %1, %6 : vector<256x128xf32>
    %8 = arith.mulf %7, %7 : vector<256x128xf32>
    %cst_2 = arith.constant dense<0.000000e+00> : vector<256xf32>
    %9 = vector.multi_reduction <add>, %8, %cst_2 [1] : vector<256x128xf32> to vector<256xf32>
    %10 = vector.shape_cast %9 : vector<256xf32> to vector<256x1xf32>
    %cst_3 = arith.constant 0.00787401571 : f32
    %11 = vector.broadcast %cst_3 : f32 to vector<256x1xf32>
    %12 = arith.mulf %10, %11 : vector<256x1xf32>
    %13 = math.sqrt %12 : vector<256x1xf32>
    %cst_4 = arith.constant 1.000000e-07 : f32
    %14 = vector.broadcast %cst_4 : f32 to vector<256x1xf32>
    %15 = arith.addf %13, %14 : vector<256x1xf32>
    %16 = tpu.reciprocal %15 {approx = true} : vector<256x1xf32> -> vector<256x1xf32>
    %c0_5 = arith.constant 0 : index
    %c0_6 = arith.constant 0 : index
    %17 = vector.load %arg2[%c0_5, %c0_6] : memref<1x128xf32, #tpu.memory_space<vmem>>, vector<1x128xf32>
    %18 = vector.broadcast %16 : vector<256x1xf32> to vector<256x128xf32>
    %19 = arith.mulf %7, %18 : vector<256x128xf32>
    %20 = vector.broadcast %17 : vector<1x128xf32> to vector<256x128xf32>
    %21 = arith.mulf %20, %19 : vector<256x128xf32>
    %c0_7 = arith.constant 0 : index
    %c0_8 = arith.constant 0 : index
    %22 = vector.load %arg3[%c0_7, %c0_8] : memref<1x128xf32, #tpu.memory_space<vmem>>, vector<1x128xf32>
    %23 = vector.broadcast %22 : vector<1x128xf32> to vector<256x128xf32>
    %24 = arith.addf %21, %23 : vector<256x128xf32>
    %25 = arith.truncf %24 : vector<256x128xf32> to vector<256x128xbf16>
    %c0_9 = arith.constant 0 : index
    %c0_10 = arith.constant 0 : index
    %26 = vector.load %arg7[%c0_9, %c0_10] : memref<256x128xbf16, #tpu.memory_space<vmem>>, vector<256x128xbf16>
    tpu.vector_store %arg7[%c0_9, %c0_10], %25 {strides = array<i32>} : memref<256x128xbf16, #tpu.memory_space<vmem>>, vector<256x128xbf16>,
    %27 = arith.truncf %24 : vector<256x128xf32> to vector<256x128xbf16>
    %c0_11 = arith.constant 0 : index
    %c0_12 = arith.constant 0 : index
    %28 = vector.load %arg4[%c0_11, %c0_12] : memref<128x128xbf16, #tpu.memory_space<vmem>>, vector<128x128xbf16>
    %cst_13 = arith.constant dense<0.000000e+00> : vector<256x128xf32>
    %29 = tpu.matmul %27, %28, %cst_13 {dimension_numbers = #tpu.dot_dimension_numbers<[1], [0], [0], [1], [0, 0, 1, 1], [], []>} : vector<256x128xbf16>, vector<128x128xbf16>, vector<256x128xf32> -> vector<256x128xf32>
    %c0_14 = arith.constant 0 : index
    %c0_15 = arith.constant 0 : index
    %30 = vector.load %arg5[%c0_14, %c0_15] : memref<1x128xf32, #tpu.memory_space<vmem>>, vector<1x128xf32>
    %31 = vector.broadcast %30 : vector<1x128xf32> to vector<256x128xf32>
    %32 = arith.addf %29, %31 : vector<256x128xf32>
    %c0_16 = arith.constant 0 : index
    %c0_17 = arith.constant 0 : index
    %33 = vector.load %arg1[%c0_16, %c0_17] : memref<256x128xbf16, #tpu.memory_space<vmem>>, vector<256x128xbf16>
    %34 = arith.extf %33 : vector<256x128xbf16> to vector<256x128xf32>
    %35 = arith.addf %34, %32 : vector<256x128xf32>
    %36 = arith.truncf %35 : vector<256x128xf32> to vector<256x128xbf16>
    %c0_18 = arith.constant 0 : index
    %c0_19 = arith.constant 0 : index
    %37 = vector.load %arg6[%c0_18, %c0_19] : memref<256x128xbf16, #tpu.memory_space<vmem>>, vector<256x128xbf16>
    tpu.vector_store %arg6[%c0_18, %c0_19], %36 {strides = array<i32>} : memref<256x128xbf16, #tpu.memory_space<vmem>>, vector<256x128xbf16>,
    return
  }
  func.func @transform_0(%arg0: i32) -> (i32, i32) {
    %c0_i32 = arith.constant 0 : i32
    %c0_i32_0 = arith.constant 0 : i32
    return %arg0, %c0_i32 : i32, i32
  }
  func.func @transform_1(%arg0: i32) -> (i32, i32) {
    %c0_i32 = arith.constant 0 : i32
    %c0_i32_0 = arith.constant 0 : i32
    %c0_i32_1 = arith.constant 0 : i32
    return %c0_i32, %c0_i32_0 : i32, i32
  }
  func.func @transform_2(%arg0: i32) -> (i32, i32) {
    %c0_i32 = arith.constant 0 : i32
    %c0_i32_0 = arith.constant 0 : i32
    %c0_i32_1 = arith.constant 0 : i32
    return %c0_i32, %c0_i32_0 : i32, i32
  }
  func.func @transform_3(%arg0: i32) -> (i32, i32) {
    %c0_i32 = arith.constant 0 : i32
    %c0_i32_0 = arith.constant 0 : i32
    %c0_i32_1 = arith.constant 0 : i32
    return %c0_i32, %c0_i32_0 : i32, i32
  }
  func.func @transform_4(%arg0: i32) -> (i32, i32) {
    %c0_i32 = arith.constant 0 : i32
    %c0_i32_0 = arith.constant 0 : i32
    %c0_i32_1 = arith.constant 0 : i32
    return %c0_i32, %c0_i32_0 : i32, i32
  }
  func.func @transform_5(%arg0: i32) -> (i32, i32) {
    %c0_i32 = arith.constant 0 : i32
    %c0_i32_0 = arith.constant 0 : i32
    return %arg0, %c0_i32 : i32, i32
  }
  func.func @transform_6(%arg0: i32) -> (i32, i32) {
    %c0_i32 = arith.constant 0 : i32
    %c0_i32_0 = arith.constant 0 : i32
    return %arg0, %c0_i32 : i32, i32
  }
}

</mosaic_0001>

<bundles_post_ra>
// kernel: tpu_custom_call.1
= control target key start
LH: loop header
LB: loop body
LE: loop exit
PB: predicated region body
PF: predicated region fallthrough
CT: control target
= control target key end

     0   :  { %12 = vsyncpa [#allocation3], 0  ;;  %s4051_s0 = inlined_call_operand.hbm [shape: bf16[512,128], index: 0, kind: input, shape index: {}]   ;;  %s4052_s1 = inlined_call_operand.vmem [shape: f32[1,128], index: 1, kind: input, shape index: {}]   ;;  %s4053_s2 = inlined_call_operand.vmem [shape: f32[1,128], index: 2, kind: input, shape index: {}]   ;;  %s4054_s3 = inlined_call_operand.hbm [shape: bf16[128,128], index: 3, kind: input, shape index: {}]   ;;  %s4055_s4 = inlined_call_operand.vmem [shape: f32[1,128], index: 4, kind: input, shape index: {}]   ;;  %s4056_s5 = inlined_call_operand.hbm [shape: bf16[512,128], index: 5, kind: output, shape index: {0}]   ;;  %s4057_s6 = inlined_call_operand.hbm [shape: bf16[512,128], index: 6, kind: output, shape index: {1}]  }
   0x1   :  { %14 = vsyncpa [#allocation3 + $0x1], 0 }
   0x2   :  { %15 = vsyncpa [#allocation6], 0 }
   0x3   :  { %16 = vsyncpa [#allocation4], 0 }
   0x4   :  { %18 = vsyncpa [#allocation4 + $0x1], 0 }
   0x5   :  { %19 = vsyncpa [#allocation9], 0 }
   0x6   :  { %21 = vsyncpa [#allocation9 + $0x1], 0  ;;  %s2822_s21 = smov 0   ;;  %s2824_s22 = smov 0  }
   0x7   :  { %s2826_s23 = smov 0   ;;  %s2828_s24 = smov 0  }
   0x8 LB: > { %s2843_s25 = sadd.s32 4294967295, %s2777_s24   ;;  %s1817_s26 = sadd.s32 4294967294, %s2777_s24   ;;  %s2777_s24 = sphi %s2828_s24, %s4109_s24   ;;  %s2773_s23 = sphi %s2826_s23, %s4108_s23   ;;  %s2769_s22 = sphi %s2824_s22, %s4107_s22   ;;  %s2765_s21 = sphi %s2822_s21, %s4106_s21  }
   0x9   : > { %p47_p0 = scmp.ne.s32.totalorder %s2769_s22, %s2765_s21  ;;  %p4058_p1 = scmp.eq.s32.totalorder %s2843_s25, 0 }
   0xa   : > { %p161_p3 = scmp.eq.s32.totalorder %s1817_s26, 1  ;;  %p1818_p5 = scmp.ge.s32.totalorder %s2777_s24, 1 }
   0xb   : > { %p2852_p4 = por %p4058_p1, %p47_p0  ;;  %p194_p7 = scmp.lt.s32.totalorder %s2777_s24, 3 }
   0xc   : > { %p2857_p6 = por %p161_p3, %p47_p0  ;;  %s2779_s30 = smov [#allocation5]  }
   0xd   : > { %s4071_s27 = scalar_select %p2852_p4, 1, 0 }
   0xe   : > { %s4072_s28 = scalar_select %p2857_p6, 1, 0 }
   0xf   : > { %p2862_p8 = pnand %p1818_p5, %p194_p7  ;;  %s212_s7 = sshll.u32 %s2779_s30, 4  ;;  %s2866_s7 = int_to_ptr.vmem [resolvable:$true] %s212_s7 }
  0x10   : > { %s2878_s9 = sadd.s32 1, %s2777_s24   ;;  %s34_s10 = sadd.s32 1, %s2773_s23 }
  0x11   : > { %s4073_s29 = scalar_select %p2862_p8, 1, 0 }
  0x12   : > { %p2425_p9 = pneg %p2862_p8  ;;  %s31_s11 = ssub.s32 %s2777_s24, %s2878_s9 }
  0x13   : > { %s2617_s14 = scalar_lea.hbm %s4054_s3, 1024 }
  0x14   : > { %p2873_p11 = pnand %p2425_p9, %p4058_p1  ;;  %p2618_p12 = scmp.ne.s32.totalorder %s4054_s3, %s2617_s14 }
  0x15   : > { %p2624_p5 = scmp.lt.u32.totalorder %s2617_s14, %s4054_s3 }
  0x16   : > { %p2619_p13 = pneg %p2873_p11 }
  0x18   : > { %p2620_p0 = pnand %p2619_p13, %p2618_p12 }
  0x1a   : > { %p2621_p3 = pneg %p2620_p0 }
  0x1c   : > { %p2626_p7 = pnand %p2624_p5, %p2621_p3 }
  0x1e   : > { %2629 = shalt.err (!%p2626_p7)
}
  0x1f   : > { %s2630_s19 = scalar_lea.vmem %s2866_s7, 1024  ;;  %p2638_p2 = scmp.lt.s32.totalorder %s2866_s7, %s2866_s7 }
  0x20   : > { %p2631_p9 = scmp.ne.s32.totalorder %s2866_s7, %s2630_s19  ;;  %p2639_p6 = scmp.lt.s32.totalorder %s2630_s19, %s2630_s19 }
  0x22   : > { %p2633_p10 = pnand %p2631_p9, %p2619_p13  ;;  %p2640_p4 = por %p2639_p6, %p2638_p2 }
  0x24   : > { %p2634_p1 = pneg %p2633_p10 }
  0x26   : > { %p2641_p8 = pnand %p2640_p4, %p2634_p1 }
  0x28   : > { %2644 = shalt.err (!%p2641_p8)
}
  0x29   : > { %s2780_s20 = smov 64   ;;  %s2781_s26 = smov 4  }
  0x2a   : > { %2428 = dma.hbm_to_vmem [thread:$0]  (!%p2873_p11), %s4054_s3, 1024, %s2866_s7, [#allocation6], %s2780_s20, %s2780_s20, %s2781_s26  }
  0x2b   : > { %p32_p1 = scmp.eq.s32.totalorder %s31_s11, 0  ;;  %p41_p2 = scmp.ne.s32.totalorder %s2773_s23, %s2769_s22 }
  0x2c   : > { %p42_p4 = scmp.eq.s32.totalorder %s2777_s24, 0  ;;  %p2441_p6 = scmp.lt.s32.totalorder %s2777_s24, 2 }
  0x2d   : > { %s2912_s13 = scalar_select %p32_p1, %s2773_s23, %s34_s10  }
  0x2e   : > { %p43_p8 = por %p42_p4, %p41_p2  ;;  %p4075_p10 = scmp.eq.s32.totalorder %s2843_s25, 1 }
  0x2f   : > { %s229_s8 = sand.u32 1, %s2773_s23   ;;  %s1912_s15 = sshll.u32 %s2777_s24, 11 }
  0x30   : > { %p2916_p12 = por %p4075_p10, %p41_p2  ;;  %s1821_s16 = sshll.u32 %s229_s8, 7 }
  0x31   : > { %s2925_s19 = scalar_lea.hbm %s4051_s0, %s1912_s15  ;;  %s233_s7 = scalar_lea.vmem [#allocation2], %s1821_s16 }
  0x32   : > { %s240_s10 = sshll.u32 %s233_s7, 4  ;;  %p2927_p11 = pnand %p2441_p6, %p43_p8  ;;  %s2931_s10 = int_to_ptr.vmem [resolvable:$true] %s240_s10 }
  0x33   : > { %s2933_s30 = scalar_lea.sflag [#allocation3], %s229_s8  ;;  %s2645_s12 = scalar_lea.hbm %s2925_s19, 2048 }
  0x34   : > { %p2646_p13 = scmp.ne.s32.totalorder %s2925_s19, %s2645_s12  ;;  %p2647_p0 = pneg %p2927_p11 }
  0x35   : > { %s2650_s17 = scalar_lea.hbm %s4051_s0, 4096  ;;  %p2651_p7 = scmp.lt.u32.totalorder %s2925_s19, %s4051_s0 }
  0x36   : > { %p2648_p3 = pnand %p2647_p0, %p2646_p13  ;;  %p2652_p9 = scmp.lt.u32.totalorder %s2650_s17, %s2645_s12 }
  0x37   : > { %p2654_p2 = scmp.lt.u32.totalorder %s2645_s12, %s2925_s19 }
  0x38   : > { %p2649_p5 = pneg %p2648_p3  ;;  %p2653_p1 = por %p2652_p9, %p2651_p7 }
  0x3a   : > { %p2655_p4 = por %p2654_p2, %p2653_p1 }
  0x3c   : > { %p2656_p6 = pnand %p2655_p4, %p2649_p5 }
  0x3e   : > { %2659 = shalt.err (!%p2656_p6)
}
  0x3f   : > { %s2660_s8 = scalar_lea.vmem %s2931_s10, 2048  ;;  %s2782_s15 = smov [#allocation2]  }
  0x40   : > { %p2661_p8 = scmp.ne.s32.totalorder %s2931_s10, %s2660_s8  ;;  %s2665_s16 = sshll.u32 %s2782_s15, 4  ;;  %s2666_s16 = int_to_ptr.vmem [resolvable:$false] %s2665_s16 }
  0x41   : > { %s2667_s18 = scalar_lea.vmem %s2666_s16, 4096  ;;  %p2668_p3 = scmp.lt.s32.totalorder %s2931_s10, %s2666_s16 }
  0x42   : > { %p2663_p10 = pnand %p2661_p8, %p2647_p0  ;;  %p2669_p7 = scmp.lt.s32.totalorder %s2667_s18, %s2660_s8 }
  0x44   : > { %p2664_p13 = pneg %p2663_p10  ;;  %p2670_p9 = por %p2669_p7, %p2668_p3 }
  0x46   : > { %p2671_p1 = pnand %p2670_p9, %p2664_p13 }
  0x48   : > { %2674 = shalt.err (!%p2671_p1)
}
  0x49   : > { %2432 = dma.hbm_to_vmem [thread:$0]  (!%p2927_p11), %s2925_s19, 2048, %s2931_s10, %s2933_s30, %s2780_s20, %s2780_s20, %s2781_s26  }
  0x4a   : > { %p4078_p0 = scmp.ne.s32.totalorder %s4073_s29, 0 }
  0x4c   : > { %252 = sbr.rel (%p4078_p0) target bundleno = 746 (0x2ea), region = 40 }
  0x53   : > { %s2967_s12 = sand.u32 1, %s2769_s22   ;;  %p4079_p5 = scmp.ne.s32.totalorder %s4071_s27, 0 }
  0x54   : > { %s2970_s17 = sshll.u32 %s2967_s12, 7  ;;  %s255_s11 = scalar_lea.sflag [#allocation3], %s2967_s12 }
  0x55   : > { %s2974_s7 = scalar_lea.vmem [#allocation2], %s2970_s17 }
  0x56   : > { %2748 = dma.done.wait (%p4079_p5), %s255_s11, 2048  }
  0x57   : > { %2750 = vsyncadd (%p4079_p5), %s255_s11, 4294965248  ;;  %p4080_p11 = scmp.eq.s32.totalorder %s2843_s25, 0 }
  0x59   : > { %2752 = dma.done.wait (%p4080_p11), [#allocation6], 1024   ;;  %p4081_p2 = pmov %p4080_p11 }
  0x5a   : > { %v2985_v0 = vld [vmem:[%s2974_s7] sm:$0xff]   ;;  %v2999_v6 = vld [vmem:[%s2974_s7 + $0x8] sm:$0xff]   ;;  %v3017_v12 = vld [vmem:[%s2974_s7 + $0x10] sm:$0xff]   ;;  %s3563_s19 = scalar_lea.vmem [#allocation8], %s2970_s17  ;;  %s1977_s10 = sshll.u32 %s2843_s25, 11 }
  0x5b   : > { %2754 = vsyncadd (%p4081_p2), [#allocation6], 4294966272  ;;  %v2988_v1 = vld [vmem:[%s2974_s7 + $0x40] sm:$0xff]   ;;  %v1981_v2 = vunpack.c.l.bf16 %v2985_v0  ;;  %v1982_v4 = vunpack.c.h.bf16 %v2985_v0  ;;  %v3002_v7 = vld [vmem:[%s2974_s7 + $0x48] sm:$0xff]   ;;  %v1985_v8 = vunpack.c.l.bf16 %v2999_v6  ;;  %v1986_v9 = vunpack.c.h.bf16 %v2999_v6  ;;  %s3892_s15 = scalar_lea.hbm %s4057_s6, %s1977_s10  ;;  %s1702_s16 = sshll.u32 %s3563_s19, 4  ;;  %s3895_s16 = int_to_ptr.vmem [resolvable:$true] %s1702_s16 }
  0x5c   : > { %v2013_v3 = vunpack.c.l.bf16 %v2988_v1  ;;  %v2014_v5 = vunpack.c.h.bf16 %v2988_v1  ;;  %v2017_v10 = vunpack.c.l.bf16 %v3002_v7  ;;  %v2018_v11 = vunpack.c.h.bf16 %v3002_v7  ;;  %v3026_v15 = vld [vmem:[%s2974_s7 + $0x50] sm:$0xff]   ;;  %v3035_v18 = vld [vmem:[%s2974_s7 + $0x18] sm:$0xff]   ;;  %v3053_v24 = vld [vmem:[%s2974_s7 + $0x20] sm:$0xff]   ;;  %s1673_s18 = scalar_lea.sflag [#allocation9], %s2967_s12  ;;  %s2675_s11 = scalar_lea.vmem %s3895_s16, 2048 }
  0x5d   : > { %364 = vadd.xlane.f32.xlu0 %v1981_v2  ;;  %v1989_v13 = vunpack.c.l.bf16 %v3017_v12  ;;  %v1990_v14 = vunpack.c.h.bf16 %v3017_v12  ;;  %v2021_v16 = vunpack.c.l.bf16 %v3026_v15  ;;  %v2022_v17 = vunpack.c.h.bf16 %v3026_v15  ;;  %v3044_v21 = vld [vmem:[%s2974_s7 + $0x58] sm:$0xff]   ;;  %v3062_v27 = vld [vmem:[%s2974_s7 + $0x60] sm:$0xff]   ;;  %v3071_v30 = vld [vmem:[%s2974_s7 + $0x28] sm:$0xff]   ;;  %p2676_p4 = scmp.ne.s32.totalorder %s3895_s16, %s2675_s11  ;;  %s2783_s27 = smov [#allocation8]  }
  0x5e   : > { %396 = vadd.xlane.f32.xlu1 %v2013_v3  ;;  %v1993_v19 = vunpack.c.l.bf16 %v3035_v18  ;;  %v1994_v20 = vunpack.c.h.bf16 %v3035_v18  ;;  %v2025_v22 = vunpack.c.l.bf16 %v3044_v21  ;;  %v2026_v23 = vunpack.c.h.bf16 %v3044_v21  ;;  %v3080_v33 = vld [vmem:[%s2974_s7 + $0x68] sm:$0xff]   ;;  %v3089_v36 = vld [vmem:[%s2974_s7 + $0x30] sm:$0xff]   ;;  %v3107_v42 = vld [vmem:[%s2974_s7 + $0x38] sm:$0xff]   ;;  %s2679_s29 = sshll.u32 %s2783_s27, 4  ;;  %s2680_s29 = int_to_ptr.vmem [resolvable:$false] %s2679_s29 }
  0x5f   : > { %v1997_v25 = vunpack.c.l.bf16 %v3053_v24  ;;  %v1998_v26 = vunpack.c.h.bf16 %v3053_v24  ;;  %v2029_v28 = vunpack.c.l.bf16 %v3062_v27  ;;  %v2030_v29 = vunpack.c.h.bf16 %v3062_v27  ;;  %v3098_v39 = vld [vmem:[%s2974_s7 + $0x70] sm:$0xff]   ;;  %v3116_v45 = vld [vmem:[%s2974_s7 + $0x78] sm:$0xff]   ;;  %p2677_p6 = pnand %p2676_p4, %p2916_p12  ;;  %s2681_s20 = scalar_lea.vmem %s2680_s29, 4096 }
  0x60   : > { %v2001_v31 = vunpack.c.l.bf16 %v3071_v30  ;;  %v2002_v32 = vunpack.c.h.bf16 %v3071_v30  ;;  %v2033_v34 = vunpack.c.l.bf16 %v3080_v33  ;;  %v2034_v35 = vunpack.c.h.bf16 %v3080_v33  ;;  %p2682_p10 = scmp.lt.s32.totalorder %s3895_s16, %s2680_s29  ;;  %p2683_p13 = scmp.lt.s32.totalorder %s2681_s20, %s2675_s11 }
  0x61   : > { %366 = vadd.xlane.f32.xlu0 %v1982_v4  ;;  %v2005_v37 = vunpack.c.l.bf16 %v3089_v36  ;;  %v2006_v38 = vunpack.c.h.bf16 %v3089_v36  ;;  %v2037_v40 = vunpack.c.l.bf16 %v3098_v39  ;;  %v2038_v41 = vunpack.c.h.bf16 %v3098_v39  ;;  %p2678_p8 = pneg %p2677_p6 }
  0x62   : > { %398 = vadd.xlane.f32.xlu1 %v2014_v5  ;;  %v2009_v43 = vunpack.c.l.bf16 %v3107_v42  ;;  %v2010_v44 = vunpack.c.h.bf16 %v3107_v42  ;;  %v2041_v46 = vunpack.c.l.bf16 %v3116_v45  ;;  %v2042_v47 = vunpack.c.h.bf16 %v3116_v45  ;;  %v2488_v45 = vld [vmem:[#allocation5 + $0x38] sm:$0xff]   ;;  %p2684_p3 = por %p2683_p13, %p2682_p10 }
  0x64   : > { %p2685_p7 = pnand %p2684_p3, %p2678_p8 }
  0x65   : > { %368 = vadd.xlane.f32.xlu0 %v1985_v8 }
  0x66   : > { %370 = vadd.xlane.f32.xlu1 %v1986_v9 }
  0x69   : > { %400 = vadd.xlane.f32.xlu0 %v2017_v10 }
  0x6a   : > { %402 = vadd.xlane.f32.xlu1 %v2018_v11 }
  0x6d   : > { %372 = vadd.xlane.f32.xlu0 %v1989_v13 }
  0x6e   : > { %374 = vadd.xlane.f32.xlu1 %v1990_v14 }
  0x71   : > { %404 = vadd.xlane.f32.xlu0 %v2021_v16 }
  0x72   : > { %406 = vadd.xlane.f32.xlu1 %v2022_v17 }
  0x75   : > { %376 = vadd.xlane.f32.xlu0 %v1993_v19 }
  0x76   : > { %378 = vadd.xlane.f32.xlu1 %v1994_v20 }
  0x79   : > { %408 = vadd.xlane.f32.xlu0 %v2025_v22 }
  0x7a   : > { %410 = vadd.xlane.f32.xlu1 %v2026_v23 }
  0x7d   : > { %380 = vadd.xlane.f32.xlu0 %v1997_v25 }
  0x7e   : > { %382 = vadd.xlane.f32.xlu1 %v1998_v26 }
  0x81   : > { %412 = vadd.xlane.f32.xlu0 %v2029_v28 }
  0x82   : > { %414 = vadd.xlane.f32.xlu1 %v2030_v29 }
  0x85   : > { %384 = vadd.xlane.f32.xlu0 %v2001_v31 }
  0x86   : > { %386 = vadd.xlane.f32.xlu1 %v2002_v32 }
  0x89   : > { %416 = vadd.xlane.f32.xlu0 %v2033_v34 }
  0x8a   : > { %418 = vadd.xlane.f32.xlu1 %v2034_v35 }
  0x8d   : > { %388 = vadd.xlane.f32.xlu0 %v2005_v37 }
  0x8e   : > { %390 = vadd.xlane.f32.xlu1 %v2006_v38 }
  0x91   : > { %420 = vadd.xlane.f32.xlu0 %v2037_v40 }
  0x92   : > { %422 = vadd.xlane.f32.xlu1 %v2038_v41 }
  0x95   : > { %392 = vadd.xlane.f32.xlu0 %v2009_v43 }
  0x96   : > { %394 = vadd.xlane.f32.xlu1 %v2010_v44 }
  0x99   : > { %424 = vadd.xlane.f32.xlu0 %v2041_v46 }
  0x9a   : > { %426 = vadd.xlane.f32.xlu1 %v2042_v47 }
  0xea   : > { %v365_v48 = vpop.xlane.xlu0 %364 }
  0xeb   : > { %v397_v49 = vpop.xlane.xlu1 %396  ;;  %v429_v50 = vmul.f32 0.0078125, %v365_v48 }
  0xec   : > { %v445_v51 = vmul.f32 0.0078125, %v397_v49 }
  0xed   : > { %v3130_v52 = vsub.f32 %v1981_v2, %v429_v50 }
  0xee   : > { %v3134_v53 = vsub.f32 %v2013_v3, %v445_v51  ;;  %v367_v54 = vpop.xlane.xlu0 %366 }
  0xef   : > { %v399_v55 = vpop.xlane.xlu1 %398  ;;  %v430_v56 = vmul.f32 0.0078125, %v367_v54  ;;  %v493_v57 = vmul.f32 %v3130_v52, %v3130_v52 }
  0xf0   : > { %v446_v58 = vmul.f32 0.0078125, %v399_v55  ;;  %v509_v61 = vmul.f32 %v3134_v53, %v3134_v53 }
  0xf1   : > { %v3140_v59 = vsub.f32 %v1982_v4, %v430_v56  ;;  %525 = vadd.xlane.f32.xlu0 %v493_v57 }
  0xf2   : > { %v3144_v60 = vsub.f32 %v2014_v5, %v446_v58  ;;  %v369_v62 = vpop.xlane.xlu0 %368 }
  0xf3   : > { %v371_v63 = vpop.xlane.xlu1 %370  ;;  %v431_v2 = vmul.f32 0.0078125, %v369_v62  ;;  %v494_v3 = vmul.f32 %v3140_v59, %v3140_v59 }
  0xf4   : > { %v432_v48 = vmul.f32 0.0078125, %v371_v63  ;;  %v510_v4 = vmul.f32 %v3144_v60, %v3144_v60 }
  0xf5   : > { %v3152_v0 = vsub.f32 %v1985_v8, %v431_v2  ;;  %557 = vadd.xlane.f32.xlu0 %v509_v61  ;;  %527 = vadd.xlane.f32.xlu1 %v494_v3 }
  0xf6   : > { %v3156_v1 = vsub.f32 %v1986_v9, %v432_v48  ;;  %v401_v5 = vpop.xlane.xlu0 %400 }
  0xf7   : > { %v403_v49 = vpop.xlane.xlu1 %402  ;;  %v447_v50 = vmul.f32 0.0078125, %v401_v5  ;;  %v495_v51 = vmul.f32 %v3152_v0, %v3152_v0 }
  0xf8   : > { %v448_v54 = vmul.f32 0.0078125, %v403_v49  ;;  %v496_v9 = vmul.f32 %v3156_v1, %v3156_v1 }
  0xf9   : > { %v3164_v8 = vsub.f32 %v2017_v10, %v447_v50  ;;  %559 = vadd.xlane.f32.xlu1 %v510_v4  ;;  %529 = vadd.xlane.f32.xlu0 %v495_v51 }
  0xfa   : > { %v3168_v6 = vsub.f32 %v2018_v11, %v448_v54  ;;  %v373_v55 = vpop.xlane.xlu0 %372 }
  0xfb   : > { %v375_v56 = vpop.xlane.xlu1 %374  ;;  %v433_v57 = vmul.f32 0.0078125, %v373_v55  ;;  %v511_v58 = vmul.f32 %v3164_v8, %v3164_v8 }
  0xfc   : > { %v434_v61 = vmul.f32 0.0078125, %v375_v56  ;;  %v512_v11 = vmul.f32 %v3168_v6, %v3168_v6 }
  0xfd   : > { %v3176_v10 = vsub.f32 %v1989_v13, %v433_v57  ;;  %531 = vadd.xlane.f32.xlu1 %v496_v9  ;;  %561 = vadd.xlane.f32.xlu0 %v511_v58 }
  0xfe   : > { %v3180_v7 = vsub.f32 %v1990_v14, %v434_v61  ;;  %v405_v62 = vpop.xlane.xlu0 %404 }
  0xff   : > { %v407_v63 = vpop.xlane.xlu1 %406  ;;  %v449_v2 = vmul.f32 0.0078125, %v405_v62  ;;  %v497_v3 = vmul.f32 %v3176_v10, %v3176_v10 }
 0x100   : > { %v450_v48 = vmul.f32 0.0078125, %v407_v63  ;;  %v498_v14 = vmul.f32 %v3180_v7, %v3180_v7 }
 0x101   : > { %v3188_v13 = vsub.f32 %v2021_v16, %v449_v2  ;;  %563 = vadd.xlane.f32.xlu1 %v512_v11  ;;  %533 = vadd.xlane.f32.xlu0 %v497_v3 }
 0x102   : > { %v3192_v12 = vsub.f32 %v2022_v17, %v450_v48  ;;  %v377_v4 = vpop.xlane.xlu0 %376 }
 0x103   : > { %v379_v5 = vpop.xlane.xlu1 %378  ;;  %v435_v49 = vmul.f32 0.0078125, %v377_v4  ;;  %v513_v50 = vmul.f32 %v3188_v13, %v3188_v13 }
 0x104   : > { %v436_v51 = vmul.f32 0.0078125, %v379_v5  ;;  %v514_v17 = vmul.f32 %v3192_v12, %v3192_v12  ;;  %v2481_v5 = vld [vmem:[#allocation5] sm:$0xff]  }
 0x105   : > { %v3200_v16 = vsub.f32 %v1993_v19, %v435_v49  ;;  %535 = vadd.xlane.f32.xlu1 %v498_v14  ;;  %565 = vadd.xlane.f32.xlu0 %v513_v50 }
 0x106   : > { %v3204_v15 = vsub.f32 %v1994_v20, %v436_v51  ;;  %v409_v54 = vpop.xlane.xlu0 %408  ;;  %2351 = vmatprep.subr.bf16.mxu0 %v2481_v5  ;;  %2399 = vmatprep.subr.bf16.mxu1 %v2481_v5 }
 0x107   : > { %v411_v9 = vpop.xlane.xlu1 %410  ;;  %v451_v55 = vmul.f32 0.0078125, %v409_v54  ;;  %v499_v56 = vmul.f32 %v3200_v16, %v3200_v16  ;;  %2352 = vmatpush3.bf16.msra.mxu0 %v2481_v5  ;;  %2407 = vmatpush3.bf16.msra.mxu1 %v2481_v5 }
 0x108   : > { %v452_v57 = vmul.f32 0.0078125, %v411_v9  ;;  %v500_v20 = vmul.f32 %v3204_v15, %v3204_v15 }
 0x109   : > { %v3212_v19 = vsub.f32 %v2025_v22, %v451_v55  ;;  %567 = vadd.xlane.f32.xlu1 %v514_v17  ;;  %537 = vadd.xlane.f32.xlu0 %v499_v56 }
 0x10a   : > { %v3216_v18 = vsub.f32 %v2026_v23, %v452_v57  ;;  %v381_v58 = vpop.xlane.xlu0 %380 }
 0x10b   : > { %v383_v61 = vpop.xlane.xlu1 %382  ;;  %v437_v11 = vmul.f32 0.0078125, %v381_v58  ;;  %v515_v62 = vmul.f32 %v3212_v19, %v3212_v19 }
 0x10c   : > { %v438_v63 = vmul.f32 0.0078125, %v383_v61  ;;  %v516_v23 = vmul.f32 %v3216_v18, %v3216_v18 }
 0x10d   : > { %v3224_v22 = vsub.f32 %v1997_v25, %v437_v11  ;;  %539 = vadd.xlane.f32.xlu1 %v500_v20  ;;  %569 = vadd.xlane.f32.xlu0 %v515_v62 }
 0x10e   : > { %v3228_v21 = vsub.f32 %v1998_v26, %v438_v63  ;;  %v413_v2 = vpop.xlane.xlu0 %412 }
 0x10f   : > { %v415_v3 = vpop.xlane.xlu1 %414  ;;  %v453_v48 = vmul.f32 0.0078125, %v413_v2  ;;  %v501_v14 = vmul.f32 %v3224_v22, %v3224_v22 }
 0x110   : > { %v454_v4 = vmul.f32 0.0078125, %v415_v3  ;;  %v502_v26 = vmul.f32 %v3228_v21, %v3228_v21 }
 0x111   : > { %v3236_v25 = vsub.f32 %v2029_v28, %v453_v48  ;;  %571 = vadd.xlane.f32.xlu1 %v516_v23  ;;  %541 = vadd.xlane.f32.xlu0 %v501_v14  ;;  %v2482_v28 = vld [vmem:[#allocation5 + $0x8] sm:$0xff]  }
 0x112   : > { %v3240_v24 = vsub.f32 %v2030_v29, %v454_v4  ;;  %v385_v49 = vpop.xlane.xlu0 %384  ;;  %2353 = vmatprep.subr.bf16.mxu0 %v2482_v28  ;;  %2400 = vmatprep.subr.bf16.mxu1 %v2482_v28 }
 0x113   : > { %v387_v50 = vpop.xlane.xlu1 %386  ;;  %v439_v51 = vmul.f32 0.0078125, %v385_v49  ;;  %v517_v17 = vmul.f32 %v3236_v25, %v3236_v25  ;;  %2354 = vmatpush3.bf16.msra.mxu0 %v2482_v28  ;;  %2408 = vmatpush3.bf16.msra.mxu1 %v2482_v28 }
 0x114   : > { %v440_v54 = vmul.f32 0.0078125, %v387_v50  ;;  %v518_v9 = vmul.f32 %v3240_v24, %v3240_v24 }
 0x115   : > { %v3248_v27 = vsub.f32 %v2001_v31, %v439_v51  ;;  %543 = vadd.xlane.f32.xlu1 %v502_v26  ;;  %573 = vadd.xlane.f32.xlu0 %v517_v17  ;;  %v2483_v31 = vld [vmem:[#allocation5 + $0x10] sm:$0xff]   ;;  %v2484_v26 = vld [vmem:[#allocation5 + $0x18] sm:$0xff]  }
 0x116   : > { %v3252_v29 = vsub.f32 %v2002_v32, %v440_v54  ;;  %v417_v55 = vpop.xlane.xlu0 %416  ;;  %2355 = vmatprep.subr.bf16.mxu0 %v2483_v31  ;;  %2401 = vmatprep.subr.bf16.mxu1 %v2483_v31 }
 0x117   : > { %v419_v56 = vpop.xlane.xlu1 %418  ;;  %v455_v57 = vmul.f32 0.0078125, %v417_v55  ;;  %v503_v20 = vmul.f32 %v3248_v27, %v3248_v27  ;;  %2356 = vmatpush3.bf16.msra.mxu0 %v2483_v31  ;;  %2409 = vmatpush3.bf16.msra.mxu1 %v2483_v31 }
 0x118   : > { %v456_v58 = vmul.f32 0.0078125, %v419_v56  ;;  %v504_v61 = vmul.f32 %v3252_v29, %v3252_v29  ;;  %2357 = vmatprep.subr.bf16.mxu0 %v2484_v26  ;;  %2402 = vmatprep.subr.bf16.mxu1 %v2484_v26 }
 0x119   : > { %v3260_v30 = vsub.f32 %v2033_v34, %v455_v57  ;;  %575 = vadd.xlane.f32.xlu1 %v518_v9  ;;  %545 = vadd.xlane.f32.xlu0 %v503_v20 }
 0x11a   : > { %v3264_v32 = vsub.f32 %v2034_v35, %v456_v58  ;;  %v389_v11 = vpop.xlane.xlu0 %388  ;;  %v2486_v58 = vld [vmem:[#allocation5 + $0x28] sm:$0xff]  }
 0x11b   : > { %4082 = vst [vmem:[#allocation14_spill] sm:$0xff] %v3260_v30  ;;  %v391_v62 = vpop.xlane.xlu1 %390  ;;  %v441_v63 = vmul.f32 0.0078125, %v389_v11  ;;  %v519_v23 = vmul.f32 %v3260_v30, %v3260_v30  ;;  %2358 = vmatpush3.bf16.msra.mxu0 %v2484_v26  ;;  %2410 = vmatpush3.bf16.msra.mxu1 %v2484_v26 }
 0x11c   : > { %4083 = vst [vmem:[#allocation15_spill] sm:$0xff] %v3264_v32  ;;  %v442_v2 = vmul.f32 0.0078125, %v391_v62  ;;  %v520_v35 = vmul.f32 %v3264_v32, %v3264_v32 }
 0x11d   : > { %v3272_v34 = vsub.f32 %v2005_v37, %v441_v63  ;;  %547 = vadd.xlane.f32.xlu1 %v504_v61  ;;  %577 = vadd.xlane.f32.xlu0 %v519_v23  ;;  %v2487_v61 = vld [vmem:[#allocation5 + $0x30] sm:$0xff]  }
 0x11e   : > { %v3276_v33 = vsub.f32 %v2006_v38, %v442_v2  ;;  %v421_v3 = vpop.xlane.xlu0 %420 }
 0x11f   : > { %4084 = vst [vmem:[#allocation16_spill] sm:$0xff] %v3272_v34  ;;  %v423_v48 = vpop.xlane.xlu1 %422  ;;  %v457_v14 = vmul.f32 0.0078125, %v421_v3  ;;  %v505_v4 = vmul.f32 %v3272_v34, %v3272_v34 }
 0x120   : > { %4085 = vst [vmem:[#allocation17_spill] sm:$0xff] %v3276_v33  ;;  %v458_v5 = vmul.f32 0.0078125, %v423_v48  ;;  %v506_v38 = vmul.f32 %v3276_v33, %v3276_v33 }
 0x121   : > { %v3284_v37 = vsub.f32 %v2037_v40, %v457_v14  ;;  %579 = vadd.xlane.f32.xlu1 %v520_v35  ;;  %549 = vadd.xlane.f32.xlu0 %v505_v4  ;;  %v2485_v40 = vld [vmem:[#allocation5 + $0x20] sm:$0xff]  }
 0x122   : > { %v3288_v36 = vsub.f32 %v2038_v41, %v458_v5  ;;  %v393_v49 = vpop.xlane.xlu0 %392  ;;  %2359 = vmatprep.subr.bf16.mxu0 %v2485_v40  ;;  %2403 = vmatprep.subr.bf16.mxu1 %v2485_v40 }
 0x123   : > { %4086 = vst [vmem:[#allocation18_spill] sm:$0xff] %v3284_v37  ;;  %v395_v50 = vpop.xlane.xlu1 %394  ;;  %v443_v51 = vmul.f32 0.0078125, %v393_v49  ;;  %v521_v17 = vmul.f32 %v3284_v37, %v3284_v37  ;;  %2360 = vmatpush3.bf16.msra.mxu0 %v2485_v40  ;;  %2411 = vmatpush3.bf16.msra.mxu1 %v2485_v40 }
 0x124   : > { %4087 = vst [vmem:[#allocation19_spill] sm:$0xff] %v3288_v36  ;;  %v444_v54 = vmul.f32 0.0078125, %v395_v50  ;;  %v522_v28 = vmul.f32 %v3288_v36, %v3288_v36  ;;  %2361 = vmatprep.subr.bf16.mxu0 %v2486_v58  ;;  %2404 = vmatprep.subr.bf16.mxu1 %v2486_v58 }
 0x125   : > { %v3296_v39 = vsub.f32 %v2009_v43, %v443_v51  ;;  %551 = vadd.xlane.f32.xlu1 %v506_v38  ;;  %581 = vadd.xlane.f32.xlu0 %v521_v17 }
 0x126   : > { %v3300_v41 = vsub.f32 %v2010_v44, %v444_v54  ;;  %v425_v9 = vpop.xlane.xlu0 %424 }
 0x127   : > { %4088 = vst [vmem:[#allocation20_spill] sm:$0xff] %v3296_v39  ;;  %v427_v55 = vpop.xlane.xlu1 %426  ;;  %v459_v56 = vmul.f32 0.0078125, %v425_v9  ;;  %v507_v57 = vmul.f32 %v3296_v39, %v3296_v39  ;;  %2362 = vmatpush3.bf16.msra.mxu0 %v2486_v58  ;;  %2412 = vmatpush3.bf16.msra.mxu1 %v2486_v58 }
 0x128   : > { %4089 = vst [vmem:[#allocation21_spill] sm:$0xff] %v3300_v41  ;;  %v460_v20 = vmul.f32 0.0078125, %v427_v55  ;;  %v508_v44 = vmul.f32 %v3300_v41, %v3300_v41  ;;  %2363 = vmatprep.subr.bf16.mxu0 %v2487_v61  ;;  %2405 = vmatprep.subr.bf16.mxu1 %v2487_v61 }
 0x129   : > { %v3308_v43 = vsub.f32 %v2041_v46, %v459_v56  ;;  %583 = vadd.xlane.f32.xlu1 %v522_v28  ;;  %553 = vadd.xlane.f32.xlu0 %v507_v57 }
 0x12a   : > { %v3312_v42 = vsub.f32 %v2042_v47, %v460_v20 }
 0x12b   : > { %4090 = vst [vmem:[#allocation22_spill] sm:$0xff] %v3308_v43  ;;  %v523_v31 = vmul.f32 %v3308_v43, %v3308_v43  ;;  %2364 = vmatpush3.bf16.msra.mxu0 %v2487_v61  ;;  %2413 = vmatpush3.bf16.msra.mxu1 %v2487_v61 }
 0x12c   : > { %4091 = vst [vmem:[#allocation23_spill] sm:$0xff] %v3312_v42  ;;  %v524_v46 = vmul.f32 %v3312_v42, %v3312_v42  ;;  %2365 = vmatprep.subr.bf16.mxu0 %v2488_v45  ;;  %2406 = vmatprep.subr.bf16.mxu1 %v2488_v45 }
 0x12d   : > { %555 = vadd.xlane.f32.xlu1 %v508_v44  ;;  %585 = vadd.xlane.f32.xlu0 %v523_v31 }
 0x12f   : > { %2366 = vmatpush3.bf16.msra.mxu0 %v2488_v45  ;;  %2414 = vmatpush3.bf16.msra.mxu1 %v2488_v45 }
 0x131   : > { %587 = vadd.xlane.f32.xlu1 %v524_v46 }
 0x17e   : > { %v526_v47 = vpop.xlane.xlu0 %525 }
 0x17f   : > { %v589_v11 = vmul.f32 0.007874016, %v526_v47 }
 0x181   : > { %2489 = vrsqrt.f32 %v589_v11  ;;  %vm623_vm0 = vcmp.eq.f32.partialorder %v589_v11, inf  ;;  %v626_v44 = vand.u32 2147483648, %v589_v11  ;;  %vm625_vm2 = vcmp.eq.f32.partialorder %v589_v11, 0.0 }
 0x182   : > { %v528_v62 = vpop.xlane.xlu1 %527  ;;  %v558_v63 = vpop.xlane.xlu0 %557 }
 0x183   : > { %v590_v23 = vmul.f32 0.007874016, %v528_v62  ;;  %v3322_v4 = vmul.f32 0.007874016, %v558_v63 }
 0x185   : > { %2491 = vrsqrt.f32 %v590_v23  ;;  %vm630_vm1 = vcmp.eq.f32.partialorder %v590_v23, inf  ;;  %v633_v47 = vand.u32 2147483648, %v590_v23  ;;  %vm632_vm3 = vcmp.eq.f32.partialorder %v590_v23, 0.0 }
 0x186   : > { %v560_v2 = vpop.xlane.xlu1 %559  ;;  %v530_v35 = vpop.xlane.xlu0 %529  ;;  %vm735_vm4 = vcmp.eq.f32.partialorder %v3322_v4, inf  ;;  %vm737_vm13 = vcmp.eq.f32.partialorder %v3322_v4, 0.0 }
 0x187   : > { %v3320_v3 = vmul.f32 0.007874016, %v530_v35  ;;  %v3326_v26 = vmul.f32 0.007874016, %v560_v2 }
 0x189   : > { %2493 = vrsqrt.f32 %v3320_v3  ;;  %vm742_vm5 = vcmp.eq.f32.partialorder %v3326_v26, inf  ;;  %vm637_vm6 = vcmp.eq.f32.partialorder %v3320_v3, inf  ;;  %vm639_vm7 = vcmp.eq.f32.partialorder %v3320_v3, 0.0 }
 0x18a   : > { %v532_v48 = vpop.xlane.xlu1 %531  ;;  %v562_v14 = vpop.xlane.xlu0 %561  ;;  %vm744_vm15 = vcmp.eq.f32.partialorder %v3326_v26, 0.0 }
 0x18b   : > { %v3324_v5 = vmul.f32 0.007874016, %v532_v48  ;;  %v2490_v38 = vpop.eup %2489  ;;  %v3329_v49 = vmul.f32 0.007874016, %v562_v14 }
 0x18c   : > { %v622_v40 = vmul.f32 %v2490_v38, %v589_v11 }
 0x18d   : > { %2495 = vrsqrt.f32 %v3324_v5  ;;  %vm644_vm8 = vcmp.eq.f32.partialorder %v3324_v5, inf  ;;  %vm646_vm9 = vcmp.eq.f32.partialorder %v3324_v5, 0.0  ;;  %vm749_vm10 = vcmp.eq.f32.partialorder %v3329_v49, inf }
 0x18e   : > { %v564_v50 = vpop.xlane.xlu1 %563  ;;  %v534_v51 = vpop.xlane.xlu0 %533  ;;  %2497 = vrsqrt.f32 %v3322_v4  ;;  %v624_v20 = vsel %vm623_vm0, %v589_v11, %v622_v40  ;;  %vm751_vm11 = vcmp.eq.f32.partialorder %v3329_v49, 0.0 }
 0x18f   : > { %v2492_v17 = vpop.eup %2491  ;;  %v3333_v54 = vmul.f32 0.007874016, %v564_v50  ;;  %2499 = vrsqrt.f32 %v3326_v26  ;;  %v3338_v9 = vmul.f32 0.007874016, %v534_v51  ;;  %v627_v63 = vsel %vm625_vm2, %v626_v44, %v624_v20 }
 0x190   : > { %2501 = vrsqrt.f32 %v3329_v49  ;;  %v629_v28 = vmul.f32 %v2492_v17, %v590_v23  ;;  %v845_v40 = vadd.f32 1e-07, %v627_v63  ;;  %v647_v44 = vand.u32 2147483648, %v3324_v5 }
 0x191   : > { %2503 = vrsqrt.f32 %v3333_v54  ;;  %vm756_vm12 = vcmp.eq.f32.partialorder %v3333_v54, inf  ;;  %vm758_vm14 = vcmp.eq.f32.partialorder %v3333_v54, 0.0  ;;  %vm651_vm0 = vcmp.eq.f32.partialorder %v3338_v9, inf }
 0x192   : > { %v536_v55 = vpop.xlane.xlu1 %535  ;;  %v566_v56 = vpop.xlane.xlu0 %565  ;;  %v631_v31 = vsel %vm630_vm1, %v590_v23, %v629_v28  ;;  %2505 = vrsqrt.f32 %v3338_v9  ;;  %vm653_vm2 = vcmp.eq.f32.partialorder %v3338_v9, 0.0 }
 0x193   : > { %v3340_v57 = vmul.f32 0.007874016, %v536_v55  ;;  %v3342_v58 = vmul.f32 0.007874016, %v566_v56  ;;  %v2494_v45 = vpop.eup %2493  ;;  %v634_v38 = vsel %vm632_vm3, %v633_v47, %v631_v31  ;;  %v640_v55 = vand.u32 2147483648, %v3320_v3 }
 0x194   : > { %v636_v51 = vmul.f32 %v2494_v45, %v3320_v3  ;;  %v846_v31 = vadd.f32 1e-07, %v634_v38 }
 0x195   : > { %2507 = vrsqrt.f32 %v3340_v57  ;;  %vm658_vm1 = vcmp.eq.f32.partialorder %v3340_v57, inf  ;;  %vm660_vm3 = vcmp.eq.f32.partialorder %v3340_v57, 0.0 }
 0x196   : > { %v568_v46 = vpop.xlane.xlu1 %567  ;;  %v538_v61 = vpop.xlane.xlu0 %537  ;;  %2509 = vrsqrt.f32 %v3342_v58  ;;  %v638_v63 = vsel %vm637_vm6, %v3320_v3, %v636_v51  ;;  %v759_v51 = vand.u32 2147483648, %v3333_v54  ;;  %vm765_vm6 = vcmp.eq.f32.partialorder %v3342_v58, 0.0 }
 0x197   : > { %v3346_v62 = vmul.f32 0.007874016, %v568_v46  ;;  %v2496_v2 = vpop.eup %2495  ;;  %v3350_v48 = vmul.f32 0.007874016, %v538_v61  ;;  %v752_v61 = vand.u32 2147483648, %v3329_v49 }
 0x198   : > { %v2498_v11 = vpop.eup %2497  ;;  %v643_v56 = vmul.f32 %v2496_v2, %v3324_v5 }
 0x199   : > { %v2500_v50 = vpop.eup %2499  ;;  %2511 = vrsqrt.f32 %v3346_v62  ;;  %v734_v46 = vmul.f32 %v2498_v11, %v3322_v4 }
 0x19a   : > { %v540_v23 = vpop.xlane.xlu1 %539  ;;  %v570_v17 = vpop.xlane.xlu0 %569  ;;  %2513 = vrsqrt.f32 %v3350_v48  ;;  %v741_v47 = vmul.f32 %v2500_v50, %v3326_v26  ;;  %v645_v11 = vsel %vm644_vm8, %v3324_v5, %v643_v56  ;;  %vm772_vm8 = vcmp.eq.f32.partialorder %v3346_v62, 0.0 }
 0x19b   : > { %v2502_v28 = vpop.eup %2501  ;;  %v3369_v45 = vmul.f32 0.007874016, %v540_v23  ;;  %2515 = vrcp.f32 %v845_v40  ;;  %v3385_v35 = vmul.f32 0.007874016, %v570_v17  ;;  %v736_v56 = vsel %vm735_vm4, %v3322_v4, %v734_v46 }
 0x19c   : > { %v2504_v20 = vpop.eup %2503  ;;  %v748_v38 = vmul.f32 %v2502_v28, %v3329_v49  ;;  %v654_v28 = vand.u32 2147483648, %v3338_v9  ;;  %v641_v17 = vsel %vm639_vm7, %v640_v55, %v638_v63  ;;  %v661_v46 = vand.u32 2147483648, %v3340_v57 }
 0x19d   : > { %v755_v23 = vmul.f32 %v2504_v20, %v3333_v54  ;;  %2517 = vrsqrt.f32 %v3369_v45  ;;  %v2506_v50 = vpop.eup %2505  ;;  %v743_v20 = vsel %vm742_vm5, %v3326_v26, %v741_v47  ;;  %vm763_vm4 = vcmp.eq.f32.partialorder %v3342_v58, inf }
 0x19e   : > { %v572_v2 = vpop.xlane.xlu1 %571  ;;  %v542_v14 = vpop.xlane.xlu0 %541  ;;  %2519 = vrcp.f32 %v846_v31  ;;  %v648_v31 = vsel %vm646_vm9, %v647_v44, %v645_v11  ;;  %v750_v42 = vsel %vm749_vm10, %v3329_v49, %v748_v38  ;;  %v650_v5 = vmul.f32 %v2506_v50, %v3338_v9 }
 0x19f   : > { %v2508_v40 = vpop.eup %2507  ;;  %v757_v3 = vsel %vm756_vm12, %v3333_v54, %v755_v23  ;;  %v3411_v55 = vmul.f32 0.007874016, %v572_v2  ;;  %2521 = vrsqrt.f32 %v3385_v35  ;;  %v3416_v63 = vmul.f32 0.007874016, %v542_v14 }
 0x1a0   : > { %v2510_v36 = vpop.eup %2509  ;;  %v657_v47 = vmul.f32 %v2508_v40, %v3340_v57  ;;  %v3418_v37 = vadd.f32 1e-07, %v641_v17  ;;  %v766_v38 = vand.u32 2147483648, %v3342_v58  ;;  %vm770_vm5 = vcmp.eq.f32.partialorder %v3346_v62, inf }
 0x1a1   : > { %v773_v23 = vand.u32 2147483648, %v3346_v62  ;;  %v3423_v2 = vadd.f32 1e-07, %v648_v31  ;;  %v753_v50 = vsel %vm751_vm11, %v752_v61, %v750_v42  ;;  %v760_v40 = vsel %vm758_vm14, %v759_v51, %v757_v3 }
 0x1a2   : > { %v544_v41 = vpop.xlane.xlu1 %543  ;;  %v574_v39 = vpop.xlane.xlu0 %573  ;;  %vm665_vm7 = vcmp.eq.f32.partialorder %v3350_v48, inf  ;;  %v652_v17 = vsel %vm651_vm0, %v3338_v9, %v650_v5  ;;  %v762_v43 = vmul.f32 %v2510_v36, %v3342_v58  ;;  %vm667_vm9 = vcmp.eq.f32.partialorder %v3350_v48, 0.0 }
 0x1a3   : > { %v2512_v44 = vpop.eup %2511  ;;  %2523 = vrsqrt.f32 %v3411_v55  ;;  %v3438_v42 = vmul.f32 0.007874016, %v544_v41  ;;  %v659_v61 = vsel %vm658_vm1, %v3340_v57, %v657_v47  ;;  %v3446_v3 = vadd.f32 1e-07, %v753_v50 }
 0x1a4   : > { %v2514_v11 = vpop.eup %2513  ;;  %v769_v51 = vmul.f32 %v2512_v44, %v3346_v62  ;;  %2525 = vrsqrt.f32 %v3416_v63  ;;  %v668_v5 = vand.u32 2147483648, %v3350_v48  ;;  %vm672_vm10 = vcmp.eq.f32.partialorder %v3369_v45, inf }
 0x1a5   : > { %v2516_v54 = vpop.eup %2515  ;;  %v664_v31 = vmul.f32 %v2514_v11, %v3350_v48  ;;  %v4092_v41 = vand.u32 2147483648, %v3322_v4  ;;  %v3456_v34 = vadd.f32 1e-07, %v760_v40  ;;  %v3458_v44 = vmul.f32 0.007874016, %v574_v39 }
 0x1a6   : > { %v576_v14 = vpop.xlane.xlu1 %575  ;;  %v546_v49 = vpop.xlane.xlu0 %545  ;;  %v4093_v50 = vand.u32 2147483648, %v3326_v26  ;;  %v655_v30 = vsel %vm653_vm2, %v654_v28, %v652_v17  ;;  %v662_v4 = vsel %vm660_vm3, %v661_v46, %v659_v61  ;;  %2527 = vrsqrt.f32 %v3438_v42 }
 0x1a7   : > { %v2518_v36 = vpop.eup %2517  ;;  %v3454_v33 = vsel %vm737_vm13, %v4092_v41, %v736_v56  ;;  %v3460_v11 = vmul.f32 0.007874016, %v576_v14  ;;  %v764_v56 = vsel %vm763_vm4, %v3342_v58, %v762_v43  ;;  %v771_v39 = vsel %vm770_vm5, %v3346_v62, %v769_v51  ;;  %v3490_v43 = vld [vmem:[%s4052_s1] ss:$0 sm:$0xff] }
 0x1a8   : > { %v2520_v47 = vpop.eup %2519  ;;  %v3466_v32 = vsel %vm744_vm15, %v4093_v50, %v743_v20  ;;  %v666_v26 = vsel %vm665_vm7, %v3350_v48, %v664_v31  ;;  %v671_v9 = vmul.f32 %v2518_v36, %v3369_v45  ;;  %2529 = vrsqrt.f32 %v3458_v44  ;;  %v3523_v62 = vld [vmem:[%s4053_s2] ss:$0 sm:$0xff] }
 0x1a9   : > { %2531 = vrsqrt.f32 %v3460_v11  ;;  %v3485_v28 = vmul.f32 0.007874016, %v546_v49  ;;  %v910_v20 = vmul.f32 %v2516_v54, %v3130_v52  ;;  %v911_v46 = vmul.f32 %v2520_v47, %v3140_v59  ;;  %v2522_v14 = vpop.eup %2521 }
 0x1aa   : > { %v548_v57 = vpop.xlane.xlu1 %547  ;;  %v578_v40 = vpop.xlane.xlu0 %577  ;;  %v3494_v17 = vadd.f32 1e-07, %v655_v30  ;;  %vm674_vm11 = vcmp.eq.f32.partialorder %v3369_v45, 0.0  ;;  %v675_v61 = vand.u32 2147483648, %v3369_v45  ;;  %vm777_vm12 = vcmp.eq.f32.partialorder %v3385_v35, inf }
 0x1ab   : > { %v3499_v49 = vadd.f32 1e-07, %v662_v4  ;;  %v767_v51 = vsel %vm765_vm6, %v766_v38, %v764_v56  ;;  %vm779_vm13 = vcmp.eq.f32.partialorder %v3385_v35, 0.0  ;;  %v780_v52 = vand.u32 2147483648, %v3385_v35 }
 0x1ac   : > { %v3505_v59 = vmul.f32 0.007874016, %v548_v57  ;;  %v774_v30 = vsel %vm772_vm8, %v773_v23, %v771_v39  ;;  %v669_v54 = vsel %vm667_vm9, %v668_v5, %v666_v26  ;;  %v673_v31 = vsel %vm672_vm10, %v3369_v45, %v671_v9 }
 0x1ad   : > { %v3514_v36 = vmul.f32 0.007874016, %v578_v40  ;;  %v2524_v58 = vpop.eup %2523  ;;  %v776_v38 = vmul.f32 %v2522_v14, %v3385_v35  ;;  %2533 = vrsqrt.f32 %v3485_v28  ;;  %v948_v41 = vmul.f32 %v3490_v43, %v910_v20 }
 0x1ae   : > { %v949_v47 = vmul.f32 %v3490_v43, %v911_v46  ;;  %v2526_v48 = vpop.eup %2525  ;;  %v3525_v23 = vadd.f32 1e-07, %v767_v51  ;;  %vm784_vm14 = vcmp.eq.f32.partialorder %v3411_v55, inf  ;;  %v787_v5 = vand.u32 2147483648, %v3411_v55  ;;  %v580_v50 = vpop.xlane.xlu1 %579 }
 0x1af   : > { %vm679_vm15 = vcmp.eq.f32.partialorder %v3416_v63, inf  ;;  %v3530_v4 = vadd.f32 1e-07, %v774_v30  ;;  %vm786_vm0 = vcmp.eq.f32.partialorder %v3411_v55, 0.0  ;;  %vm681_vm1 = vcmp.eq.f32.partialorder %v3416_v63, 0.0  ;;  %v550_v39 = vpop.xlane.xlu0 %549 }
 0x1b0   : > { %v682_v56 = vand.u32 2147483648, %v3416_v63  ;;  %2535 = vrsqrt.f32 %v3505_v59  ;;  %v3536_v26 = vadd.f32 1e-07, %v669_v54  ;;  %v676_v9 = vsel %vm674_vm11, %v675_v61, %v673_v31  ;;  %v2528_v46 = vpop.eup %2527 }
 0x1b1   : > { %v987_v57 = vadd.f32 %v3523_v62, %v948_v41  ;;  %v988_v20 = vadd.f32 %v3523_v62, %v949_v47  ;;  %v778_v40 = vsel %vm777_vm12, %v3385_v35, %v776_v38  ;;  %v783_v14 = vmul.f32 %v2524_v58, %v3411_v55 }
 0x1b2   : > { %v678_v51 = vmul.f32 %v2526_v48, %v3416_v63  ;;  %2537 = vrsqrt.f32 %v3514_v36  ;;  %v2530_v30 = vpop.eup %2529  ;;  %vm686_vm2 = vcmp.eq.f32.partialorder %v3438_v42, inf  ;;  %v689_v45 = vand.u32 2147483648, %v3438_v42 }
 0x1b3   : > { %v1019_v61 = vpack.c.bf16 %v988_v20, %v987_v57  ;;  %v861_v54 = vadd.f32 1e-07, %v3454_v33  ;;  %v2532_v31 = vpop.eup %2531  ;;  %vm688_vm3 = vcmp.eq.f32.partialorder %v3438_v42, 0.0  ;;  %vm791_vm4 = vcmp.eq.f32.partialorder %v3458_v44, inf  ;;  %v552_v57 = vpop.xlane.xlu1 %551 }
 0x1b4   : > { %v794_v58 = vand.u32 2147483648, %v3458_v44  ;;  %v862_v38 = vadd.f32 1e-07, %v3466_v32  ;;  %v3555_v41 = vmul.f32 0.007874016, %v580_v50  ;;  %v781_v48 = vsel %vm779_vm13, %v780_v52, %v778_v40  ;;  %v582_v50 = vpop.xlane.xlu0 %581 }
 0x1b5   : > { %v3557_v47 = vadd.f32 1e-07, %v676_v9  ;;  %vm793_vm5 = vcmp.eq.f32.partialorder %v3458_v44, 0.0  ;;  %2047 = vst [vmem:[%s3563_s19] sm:$0xff] %v1019_v61   ;;  %2367 = vmatprep.mubr.bf16.mxu0 %v1019_v61  ;;  %2539 = vrcp.f32 %v861_v54  ;;  %v3566_v33 = vmul.f32 0.007874016, %v550_v39 }
 0x1b6   : > { %v785_v32 = vsel %vm784_vm14, %v3411_v55, %v783_v14  ;;  %v680_v35 = vsel %vm679_vm15, %v3416_v63, %v678_v51  ;;  %v685_v52 = vmul.f32 %v2528_v46, %v3438_v42  ;;  %2541 = vrcp.f32 %v862_v38 }
 0x1b7   : > { %v790_v9 = vmul.f32 %v2530_v30, %v3458_v44  ;;  %v797_v20 = vmul.f32 %v2532_v31, %v3460_v11  ;;  %vm798_vm6 = vcmp.eq.f32.partialorder %v3460_v11, inf  ;;  %vm800_vm7 = vcmp.eq.f32.partialorder %v3460_v11, 0.0  ;;  %v2534_v39 = vpop.eup %2533  ;;  %v584_v31 = vpop.xlane.xlu1 %583 }
 0x1b8   : > { %v3579_v40 = vadd.f32 1e-07, %v781_v48  ;;  %v801_v14 = vand.u32 2147483648, %v3460_v11  ;;  %vm693_vm8 = vcmp.eq.f32.partialorder %v3485_v28, inf  ;;  %2543 = vrsqrt.f32 %v3555_v41 }
 0x1b9   : > { %v788_v46 = vsel %vm786_vm0, %v787_v5, %v785_v32  ;;  %v683_v51 = vsel %vm681_vm1, %v682_v56, %v680_v35  ;;  %vm695_vm9 = vcmp.eq.f32.partialorder %v3485_v28, 0.0  ;;  %v696_v30 = vand.u32 2147483648, %v3485_v28  ;;  %v554_v32 = vpop.xlane.xlu0 %553 }
 0x1ba   : > { %2545 = vrsqrt.f32 %v3566_v33  ;;  %v2536_v61 = vpop.eup %2535  ;;  %v687_v54 = vsel %vm686_vm2, %v3438_v42, %v685_v52  ;;  %vm700_vm10 = vcmp.eq.f32.partialorder %v3505_v59, inf  ;;  %v3596_v55 = vmul.f32 0.007874016, %v552_v57 }
 0x1bb   : > { %2547 = vrcp.f32 %v3418_v37  ;;  %v792_v63 = vsel %vm791_vm4, %v3458_v44, %v790_v9  ;;  %v799_v5 = vsel %vm798_vm6, %v3460_v11, %v797_v20  ;;  %v692_v56 = vmul.f32 %v2534_v39, %v3485_v28 }
 0x1bc   : > { %vm702_vm11 = vcmp.eq.f32.partialorder %v3505_v59, 0.0  ;;  %2549 = vrcp.f32 %v3423_v2  ;;  %v2538_v38 = vpop.eup %2537  ;;  %v3607_v48 = vadd.f32 1e-07, %v788_v46  ;;  %v3609_v37 = vadd.f32 1e-07, %v683_v51 }
 0x1bd   : > { %v703_v57 = vand.u32 2147483648, %v3505_v59  ;;  %vm805_vm12 = vcmp.eq.f32.partialorder %v3514_v36, inf  ;;  %v690_v35 = vsel %vm688_vm3, %v689_v45, %v687_v54  ;;  %v699_v52 = vmul.f32 %v2536_v61, %v3505_v59  ;;  %v556_v61 = vpop.xlane.xlu1 %555 }
 0x1be   : > { %vm807_vm13 = vcmp.eq.f32.partialorder %v3514_v36, 0.0  ;;  %v3617_v9 = vmul.f32 0.007874016, %v582_v50  ;;  %2551 = vrcp.f32 %v3446_v3  ;;  %v795_v2 = vsel %vm793_vm5, %v794_v58, %v792_v63 }
 0x1bf   : > { %v802_v20 = vsel %vm800_vm7, %v801_v14, %v799_v5  ;;  %2553 = vrcp.f32 %v3456_v34  ;;  %v3625_v39 = vmul.f32 0.007874016, %v584_v31  ;;  %v2540_v42 = vpop.eup %2539  ;;  %v694_v45 = vsel %vm693_vm8, %v3485_v28, %v692_v56 }
 0x1c0   : > { %v804_v50 = vmul.f32 %v2538_v38, %v3514_v36  ;;  %2555 = vrsqrt.f32 %v3596_v55  ;;  %v3632_v3 = vmul.f32 0.007874016, %v554_v32  ;;  %v2542_v44 = vpop.eup %2541  ;;  %v3634_v58 = vadd.f32 1e-07, %v690_v35 }
 0x1c1   : > { %v808_v11 = vand.u32 2147483648, %v3514_v36  ;;  %v926_v34 = vmul.f32 %v2540_v42, %v3134_v53  ;;  %2557 = vrsqrt.f32 %v3617_v9  ;;  %v3639_v14 = vadd.f32 1e-07, %v795_v2 }
 0x1c2   : > { %v701_v46 = vsel %vm700_vm10, %v3505_v59, %v699_v52  ;;  %v927_v51 = vmul.f32 %v2542_v44, %v3144_v60  ;;  %vm812_vm14 = vcmp.eq.f32.partialorder %v3555_v41, inf  ;;  %2559 = vrsqrt.f32 %v3625_v39  ;;  %v2544_v54 = vpop.eup %2543 }
 0x1c3   : > { %v3647_v63 = vadd.f32 1e-07, %v802_v20  ;;  %v697_v53 = vsel %vm695_vm9, %v696_v30, %v694_v45  ;;  %v964_v5 = vmul.f32 %v3490_v43, %v926_v34  ;;  %v815_v56 = vand.u32 2147483648, %v3555_v41 }
 0x1c4   : > { %v2546_v31 = vpop.eup %2545  ;;  %v806_v60 = vsel %vm805_vm12, %v3514_v36, %v804_v50  ;;  %v965_v38 = vmul.f32 %v3490_v43, %v927_v51  ;;  %vm707_vm15 = vcmp.eq.f32.partialorder %v3566_v33, inf  ;;  %2561 = vrsqrt.f32 %v3632_v3 }
 0x1c5   : > { %v2548_v32 = vpop.eup %2547  ;;  %v704_v28 = vsel %vm702_vm11, %v703_v57, %v701_v46  ;;  %vm814_vm0 = vcmp.eq.f32.partialorder %v3555_v41, 0.0  ;;  %v710_v30 = vand.u32 2147483648, %v3566_v33  ;;  %2563 = vrcp.f32 %v3494_v17 }
 0x1c6   : > { %v3664_v35 = vmul.f32 0.007874016, %v556_v61  ;;  %v2550_v52 = vpop.eup %2549  ;;  %v3666_v2 = vadd.f32 1e-07, %v697_v53  ;;  %v1003_v20 = vadd.f32 %v3523_v62, %v964_v5  ;;  %v1004_v42 = vadd.f32 %v3523_v62, %v965_v38  ;;  %v586_v53 = vpop.xlane.xlu0 %585 }
 0x1c7   : > { %v912_v45 = vmul.f32 %v2548_v32, %v3152_v0  ;;  %v809_v59 = vsel %vm807_vm13, %v808_v11, %v806_v60  ;;  %v811_v57 = vmul.f32 %v2544_v54, %v3555_v41  ;;  %vm709_vm1 = vcmp.eq.f32.partialorder %v3566_v33, 0.0 }
 0x1c8   : > { %v913_v17 = vmul.f32 %v2550_v52, %v3156_v1  ;;  %2565 = vrcp.f32 %v3499_v49  ;;  %v2552_v50 = vpop.eup %2551  ;;  %v3677_v44 = vadd.f32 1e-07, %v704_v28  ;;  %v1027_v34 = vpack.c.bf16 %v1004_v42, %v1003_v20 }
 0x1c9   : > { %v950_v46 = vmul.f32 %v3490_v43, %v912_v45  ;;  %vm714_vm2 = vcmp.eq.f32.partialorder %v3596_v55, inf  ;;  %v2554_v0 = vpop.eup %2553  ;;  %v706_v36 = vmul.f32 %v2546_v31, %v3566_v33  ;;  %v928_v51 = vmul.f32 %v2552_v50, %v3164_v8 }
 0x1ca   : > { %v951_v11 = vmul.f32 %v3490_v43, %v913_v17  ;;  %2567 = vrsqrt.f32 %v3664_v35  ;;  %v2556_v1 = vpop.eup %2555  ;;  %v3685_v61 = vadd.f32 1e-07, %v809_v59  ;;  %2289 = vst [vmem:[%s3563_s19 + $0x40] sm:$0xff] %v1027_v34   ;;  %2383 = vmatprep.mubr.bf16.mxu1 %v1027_v34  ;;  %v717_v49 = vand.u32 2147483648, %v3596_v55 }
 0x1cb   : > { %vm819_vm3 = vcmp.eq.f32.partialorder %v3617_v9, inf  ;;  %v929_v54 = vmul.f32 %v2554_v0, %v3168_v6  ;;  %v2558_v5 = vpop.eup %2557  ;;  %v813_v31 = vsel %vm812_vm14, %v3555_v41, %v811_v57  ;;  %v989_v8 = vadd.f32 %v3523_v62, %v950_v46 }
 0x1cc   : > { %v990_v60 = vadd.f32 %v3523_v62, %v951_v11  ;;  %vm716_vm4 = vcmp.eq.f32.partialorder %v3596_v55, 0.0  ;;  %v966_v38 = vmul.f32 %v3490_v43, %v928_v51  ;;  %v2560_v32 = vpop.eup %2559  ;;  %vm821_vm5 = vcmp.eq.f32.partialorder %v3617_v9, 0.0 }
 0x1cd   : > { %v822_v6 = vand.u32 2147483648, %v3617_v9  ;;  %v967_v28 = vmul.f32 %v3490_v43, %v929_v54  ;;  %vm826_vm6 = vcmp.eq.f32.partialorder %v3625_v39, inf  ;;  %v829_v52 = vand.u32 2147483648, %v3625_v39 }
 0x1ce   : > { %v708_v20 = vsel %vm707_vm15, %v3566_v33, %v706_v36  ;;  %v1020_v42 = vpack.c.bf16 %v990_v60, %v989_v8  ;;  %v713_v45 = vmul.f32 %v2556_v1, %v3596_v55  ;;  %vm828_vm7 = vcmp.eq.f32.partialorder %v3625_v39, 0.0  ;;  %v2562_v57 = vpop.eup %2561  ;;  %v588_v1 = vpop.xlane.xlu1 %587 }
 0x1cf   : > { %v3708_v59 = vmul.f32 0.007874016, %v586_v53  ;;  %v816_v17 = vsel %vm814_vm0, %v815_v56, %v813_v31  ;;  %v818_v50 = vmul.f32 %v2558_v5, %v3617_v9  ;;  %v1005_v34 = vadd.f32 %v3523_v62, %v966_v38  ;;  %v2564_v0 = vpop.eup %2563 }
 0x1d0   : > { %v1006_v46 = vadd.f32 %v3523_v62, %v967_v28  ;;  %2282 = vst [vmem:[%s3563_s19 + $0x8] sm:$0xff] %v1020_v42   ;;  %2368 = vmatmul.mubr.bf16.vlgmr.msra.gmra.mrb[0].mxu0 %v1020_v42  ;;  %v825_v36 = vmul.f32 %v2560_v32, %v3625_v39  ;;  %vm721_vm8 = vcmp.eq.f32.partialorder %v3632_v3, inf  ;;  %vm723_vm9 = vcmp.eq.f32.partialorder %v3632_v3, 0.0 }
 0x1d1   : > { %2569 = vrsqrt.f32 %v3708_v59  ;;  %v711_v41 = vsel %vm709_vm1, %v710_v30, %v708_v20  ;;  %v724_v11 = vand.u32 2147483648, %v3632_v3  ;;  %v914_v51 = vmul.f32 %v2564_v0, %v3176_v10 }
 0x1d2   : > { %v1028_v56 = vpack.c.bf16 %v1006_v46, %v1005_v34  ;;  %v2566_v54 = vpop.eup %2565  ;;  %v3724_v53 = vadd.f32 1e-07, %v816_v17  ;;  %v715_v5 = vsel %vm714_vm2, %v3596_v55, %v713_v45  ;;  %v720_v31 = vmul.f32 %v2562_v57, %v3632_v3 }
 0x1d3   : > { %2571 = vrcp.f32 %v3525_v23  ;;  %v820_v33 = vsel %vm819_vm3, %v3617_v9, %v818_v50  ;;  %v915_v10 = vmul.f32 %v2566_v54, %v3180_v7  ;;  %v952_v30 = vmul.f32 %v3490_v43, %v914_v51 }
 0x1d4   : > { %2290 = vst [vmem:[%s3563_s19 + $0x48] sm:$0xff] %v1028_v56   ;;  %2384 = vmatmul.mubr.bf16.vlgmr.msra.gmra.mrb[0].mxu1 %v1028_v56  ;;  %2573 = vrcp.f32 %v3530_v4  ;;  %v2568_v8 = vpop.eup %2567  ;;  %v3738_v60 = vadd.f32 1e-07, %v711_v41  ;;  %v827_v38 = vsel %vm826_vm6, %v3625_v39, %v825_v36  ;;  %v3743_v23 = vmul.f32 0.007874016, %v588_v1 }
 0x1d5   : > { %2575 = vrcp.f32 %v3536_v26  ;;  %v718_v32 = vsel %vm716_vm4, %v717_v49, %v715_v5  ;;  %v953_v7 = vmul.f32 %v3490_v43, %v915_v10  ;;  %vm728_vm10 = vcmp.eq.f32.partialorder %v3664_v35, inf }
 0x1d6   : > { %2577 = vrcp.f32 %v3557_v47  ;;  %v823_v4 = vsel %vm821_vm5, %v822_v6, %v820_v33  ;;  %v722_v28 = vsel %vm721_vm8, %v3632_v3, %v720_v31  ;;  %v727_v20 = vmul.f32 %v2568_v8, %v3664_v35 }
 0x1d7   : > { %2579 = vrsqrt.f32 %v3743_v23  ;;  %v830_v26 = vsel %vm828_vm7, %v829_v52, %v827_v38  ;;  %v991_v55 = vadd.f32 %v3523_v62, %v952_v30  ;;  %v992_v49 = vadd.f32 %v3523_v62, %v953_v7 }
 0x1d8   : > { %2581 = vrcp.f32 %v3579_v40  ;;  %v858_v47 = vadd.f32 1e-07, %v718_v32  ;;  %vm730_vm11 = vcmp.eq.f32.partialorder %v3664_v35, 0.0  ;;  %v731_v9 = vand.u32 2147483648, %v3664_v35 }
 0x1d9   : > { %2583 = vrcp.f32 %v3607_v48  ;;  %v3766_v6 = vadd.f32 1e-07, %v823_v4  ;;  %v725_v39 = vsel %vm723_vm9, %v724_v11, %v722_v28  ;;  %v1021_v52 = vpack.c.bf16 %v992_v49, %v991_v55 }
 0x1da   : > { %2585 = vrcp.f32 %v3609_v37  ;;  %v3771_v45 = vadd.f32 1e-07, %v830_v26  ;;  %v729_v40 = vsel %vm728_vm10, %v3664_v35, %v727_v20  ;;  %vm833_vm12 = vcmp.eq.f32.partialorder %v3708_v59, inf }
 0x1db   : > { %v2570_v42 = vpop.eup %2569  ;;  %2587 = vrcp.f32 %v3634_v58  ;;  %2283 = vst [vmem:[%s3563_s19 + $0x10] sm:$0xff] %v1021_v52   ;;  %2371 = vmatprep.mubr.bf16.mxu0 %v1021_v52  ;;  %vm835_vm13 = vcmp.eq.f32.partialorder %v3708_v59, 0.0  ;;  %v836_v3 = vand.u32 2147483648, %v3708_v59  ;;  %v3783_v57 = vadd.f32 1e-07, %v725_v39 }
 0x1dc   : > { %v832_v48 = vmul.f32 %v2570_v42, %v3708_v59  ;;  %2589 = vrcp.f32 %v3639_v14  ;;  %vm840_vm14 = vcmp.eq.f32.partialorder %v3743_v23, inf  ;;  %vm842_vm15 = vcmp.eq.f32.partialorder %v3743_v23, 0.0 }
 0x1dd   : > { %v2572_v37 = vpop.eup %2571  ;;  %2591 = vrcp.f32 %v3647_v63  ;;  %v732_v17 = vsel %vm730_vm11, %v731_v9, %v729_v40  ;;  %v843_v36 = vand.u32 2147483648, %v3743_v23 }
 0x1de   : > { %v2574_v58 = vpop.eup %2573  ;;  %v834_v50 = vsel %vm833_vm12, %v3708_v59, %v832_v48  ;;  %v930_v34 = vmul.f32 %v2572_v37, %v3188_v13  ;;  %2593 = vrcp.f32 %v3666_v2  ;;  %v3799_v13 = vadd.f32 1e-07, %v732_v17 }
 0x1df   : > { %v2576_v14 = vpop.eup %2575  ;;  %v837_v46 = vsel %vm835_vm13, %v836_v3, %v834_v50  ;;  %v931_v0 = vmul.f32 %v2574_v58, %v3192_v12  ;;  %2595 = vrcp.f32 %v3677_v44  ;;  %v4094_v58 = vld [vmem:[#allocation14_spill] sm:$0xff] }
 0x1e0   : > { %v2578_v41 = vpop.eup %2577  ;;  %v875_v63 = vadd.f32 1e-07, %v837_v46  ;;  %v968_v56 = vmul.f32 %v3490_v43, %v930_v34  ;;  %v916_v35 = vmul.f32 %v2576_v14, %v3200_v16  ;;  %2597 = vrcp.f32 %v3685_v61  ;;  %v4095_v34 = vld [vmem:[#allocation15_spill] sm:$0xff] }
 0x1e1   : > { %v2580_v59 = vpop.eup %2579  ;;  %v969_v2 = vmul.f32 %v3490_v43, %v931_v0  ;;  %v917_v11 = vmul.f32 %v2578_v41, %v3204_v15  ;;  %2599 = vrcp.f32 %v3724_v53 }
 0x1e2   : > { %v2582_v12 = vpop.eup %2581  ;;  %2601 = vrcp.f32 %v875_v63  ;;  %v1007_v44 = vadd.f32 %v3523_v62, %v968_v56  ;;  %v839_v51 = vmul.f32 %v2580_v59, %v3743_v23  ;;  %v954_v1 = vmul.f32 %v3490_v43, %v916_v35  ;;  %v4096_v35 = vld [vmem:[#allocation16_spill] sm:$0xff] }
 0x1e3   : > { %v2584_v16 = vpop.eup %2583  ;;  %v1008_v61 = vadd.f32 %v3523_v62, %v969_v2  ;;  %v955_v54 = vmul.f32 %v3490_v43, %v917_v11  ;;  %v932_v5 = vmul.f32 %v2582_v12, %v3212_v19  ;;  %2603 = vrcp.f32 %v3738_v60  ;;  %v4097_v11 = vld [vmem:[#allocation17_spill] sm:$0xff] }
 0x1e4   : > { %v2586_v15 = vpop.eup %2585  ;;  %v841_v53 = vsel %vm840_vm14, %v3743_v23, %v839_v51  ;;  %v993_v31 = vadd.f32 %v3523_v62, %v954_v1  ;;  %v933_v33 = vmul.f32 %v2584_v16, %v3216_v18  ;;  %2605 = vrcp.f32 %v858_v47 }
 0x1e5   : > { %v2588_v10 = vpop.eup %2587  ;;  %v1029_v30 = vpack.c.bf16 %v1008_v61, %v1007_v44  ;;  %v844_v8 = vsel %vm842_vm15, %v843_v36, %v841_v53  ;;  %v994_v19 = vadd.f32 %v3523_v62, %v955_v54  ;;  %v970_v60 = vmul.f32 %v3490_v43, %v932_v5  ;;  %v4098_v44 = vld [vmem:[#allocation22_spill] sm:$0xff] }
 0x1e6   : > { %v2590_v38 = vpop.eup %2589  ;;  %v876_v32 = vadd.f32 1e-07, %v844_v8  ;;  %v971_v7 = vmul.f32 %v3490_v43, %v933_v33  ;;  %v918_v4 = vmul.f32 %v2586_v15, %v3224_v22  ;;  %v919_v28 = vmul.f32 %v2588_v10, %v3228_v21 }
 0x1e7   : > { %v2592_v18 = vpop.eup %2591  ;;  %2291 = vst [vmem:[%s3563_s19 + $0x50] sm:$0xff] %v1029_v30   ;;  %2387 = vmatprep.mubr.bf16.mxu1 %v1029_v30  ;;  %v1022_v20 = vpack.c.bf16 %v994_v19, %v993_v31  ;;  %v1009_v23 = vadd.f32 %v3523_v62, %v970_v60  ;;  %v934_v26 = vmul.f32 %v2590_v38, %v3236_v25  ;;  %2607 = vrcp.f32 %v3766_v6  ;;  %v4099_v31 = vld [vmem:[#allocation18_spill] sm:$0xff]  ;;  %v4100_v19 = vld [vmem:[#allocation23_spill] sm:$0xff] }
 0x1e8   : > { %v2594_v55 = vpop.eup %2593  ;;  %2609 = vrcp.f32 %v876_v32  ;;  %v1010_v49 = vadd.f32 %v3523_v62, %v971_v7  ;;  %v956_v47 = vmul.f32 %v3490_v43, %v918_v4  ;;  %v957_v22 = vmul.f32 %v3490_v43, %v919_v28  ;;  %v4101_v32 = vld [vmem:[#allocation19_spill] sm:$0xff] }
 0x1e9   : > { %v2596_v9 = vpop.eup %2595  ;;  %2284 = vst [vmem:[%s3563_s19 + $0x18] sm:$0xff] %v1022_v20   ;;  %2372 = vmatmul.mubr.bf16.gmra.mrb[4].mxu0 %v1022_v20  ;;  %v935_v21 = vmul.f32 %v2592_v18, %v3240_v24  ;;  %v972_v39 = vmul.f32 %v3490_v43, %v934_v26  ;;  %v920_v25 = vmul.f32 %v2594_v55, %v3248_v27  ;;  %2611 = vrcp.f32 %v3771_v45  ;;  %v4102_v55 = vld [vmem:[#allocation20_spill] sm:$0xff] }
 0x1ea   : > { %v2598_v6 = vpop.eup %2597  ;;  %v1030_v52 = vpack.c.bf16 %v1010_v49, %v1009_v23  ;;  %v995_v42 = vadd.f32 %v3523_v62, %v956_v47  ;;  %v996_v40 = vadd.f32 %v3523_v62, %v957_v22  ;;  %v921_v48 = vmul.f32 %v2596_v9, %v3252_v29 }
 0x1eb   : > { %v2600_v3 = vpop.eup %2599  ;;  %v973_v37 = vmul.f32 %v3490_v43, %v935_v21  ;;  %v958_v24 = vmul.f32 %v3490_v43, %v920_v25  ;;  %v936_v17 = vmul.f32 %v2598_v6, %v4094_v58  ;;  %2613 = vrcp.f32 %v3783_v57 }
 0x1ec   : > { %v2602_v50 = vpop.eup %2601  ;;  %2292 = vst [vmem:[%s3563_s19 + $0x58] sm:$0xff] %v1030_v52   ;;  %2388 = vmatmul.mubr.bf16.gmra.mrb[4].mxu1 %v1030_v52  ;;  %v1023_v27 = vpack.c.bf16 %v996_v40, %v995_v42  ;;  %v959_v45 = vmul.f32 %v3490_v43, %v921_v48  ;;  %v937_v14 = vmul.f32 %v2600_v3, %v4095_v34  ;;  %2615 = vrcp.f32 %v3799_v13 }
 0x1ed   : > { %v2604_v46 = vpop.eup %2603  ;;  %v1011_v29 = vadd.f32 %v3523_v62, %v972_v39  ;;  %v1012_v0 = vadd.f32 %v3523_v62, %v973_v37  ;;  %v974_v36 = vmul.f32 %v3490_v43, %v936_v17  ;;  %v997_v63 = vadd.f32 %v3523_v62, %v958_v24  ;;  %v4103_v39 = vld [vmem:[#allocation21_spill] sm:$0xff] }
 0x1ee   : > { %v2606_v41 = vpop.eup %2605  ;;  %2285 = vst [vmem:[%s3563_s19 + $0x20] sm:$0xff] %v1023_v27   ;;  %2375 = vmatprep.mubr.bf16.mxu0 %v1023_v27  ;;  %v998_v56 = vadd.f32 %v3523_v62, %v959_v45  ;;  %v975_v57 = vmul.f32 %v3490_v43, %v937_v14  ;;  %v922_v59 = vmul.f32 %v2604_v46, %v4096_v35 }
 0x1ef   : > { %v1031_v2 = vpack.c.bf16 %v1012_v0, %v1011_v29  ;;  %v923_v12 = vmul.f32 %v2606_v41, %v4097_v11  ;;  %v940_v51 = vmul.f32 %v2602_v50, %v4098_v44  ;;  %v1013_v13 = vadd.f32 %v3523_v62, %v974_v36 }
 0x1f0   : > { %v1024_v1 = vpack.c.bf16 %v998_v56, %v997_v63  ;;  %v1014_v16 = vadd.f32 %v3523_v62, %v975_v57  ;;  %v960_v61 = vmul.f32 %v3490_v43, %v922_v59 }
 0x1f1   : > { %v2608_v54 = vpop.eup %2607  ;;  %2293 = vst [vmem:[%s3563_s19 + $0x60] sm:$0xff] %v1031_v2   ;;  %2391 = vmatprep.mubr.bf16.mxu1 %v1031_v2  ;;  %v961_v5 = vmul.f32 %v3490_v43, %v923_v12  ;;  %v978_v38 = vmul.f32 %v3490_v43, %v940_v51 }
 0x1f2   : > { %v2610_v15 = vpop.eup %2609  ;;  %2286 = vst [vmem:[%s3563_s19 + $0x28] sm:$0xff] %v1024_v1   ;;  %2376 = vmatmul.mubr.bf16.gmra.mrb[8].mxu0 %v1024_v1  ;;  %v1032_v53 = vpack.c.bf16 %v1014_v16, %v1013_v13  ;;  %v938_v33 = vmul.f32 %v2608_v54, %v4099_v31  ;;  %v999_v30 = vadd.f32 %v3523_v62, %v960_v61 }
 0x1f3   : > { %v2612_v10 = vpop.eup %2611  ;;  %v1000_v8 = vadd.f32 %v3523_v62, %v961_v5  ;;  %v941_v60 = vmul.f32 %v2610_v15, %v4100_v19  ;;  %v1017_v47 = vadd.f32 %v3523_v62, %v978_v38 }
 0x1f4   : > { %2294 = vst [vmem:[%s3563_s19 + $0x68] sm:$0xff] %v1032_v53   ;;  %2392 = vmatmul.mubr.bf16.gmra.mrb[8].mxu1 %v1032_v53  ;;  %v939_v7 = vmul.f32 %v2612_v10, %v4101_v32  ;;  %v976_v4 = vmul.f32 %v3490_v43, %v938_v33 }
 0x1f5   : > { %v1025_v28 = vpack.c.bf16 %v1000_v8, %v999_v30  ;;  %v979_v18 = vmul.f32 %v3490_v43, %v941_v60  ;;  %v2614_v20 = vpop.eup %2613 }
 0x1f6   : > { %v977_v23 = vmul.f32 %v3490_v43, %v939_v7  ;;  %v2616_v26 = vpop.eup %2615  ;;  %v924_v49 = vmul.f32 %v2614_v20, %v4102_v55  ;;  %v1015_v9 = vadd.f32 %v3523_v62, %v976_v4 }
 0x1f7   : > { %2287 = vst [vmem:[%s3563_s19 + $0x30] sm:$0xff] %v1025_v28   ;;  %2379 = vmatprep.mubr.bf16.mxu0 %v1025_v28  ;;  %v1018_v22 = vadd.f32 %v3523_v62, %v979_v18  ;;  %v925_v25 = vmul.f32 %v2616_v26, %v4103_v39 }
 0x1f8   : > { %v1016_v21 = vadd.f32 %v3523_v62, %v977_v23  ;;  %v962_v6 = vmul.f32 %v3490_v43, %v924_v49 }
 0x1f9   : > { %v1034_v52 = vpack.c.bf16 %v1018_v22, %v1017_v47  ;;  %v963_v40 = vmul.f32 %v3490_v43, %v925_v25 }
 0x1fa   : > { %v1033_v42 = vpack.c.bf16 %v1016_v21, %v1015_v9  ;;  %v1001_v48 = vadd.f32 %v3523_v62, %v962_v6 }
 0x1fb   : > { %2296 = vst [vmem:[%s3563_s19 + $0x78] sm:$0xff] %v1034_v52   ;;  %v1002_v3 = vadd.f32 %v3523_v62, %v963_v40 }
 0x1fc   : > { %2295 = vst [vmem:[%s3563_s19 + $0x70] sm:$0xff] %v1033_v42   ;;  %2395 = vmatprep.mubr.bf16.mxu1 %v1033_v42 }
 0x1fd   : > { %2396 = vmatmul.mubr.bf16.gmra.mrb[12].mxu1 %v1034_v52  ;;  %v1026_v37 = vpack.c.bf16 %v1002_v3, %v1001_v48 }
 0x1ff   : > { %2288 = vst [vmem:[%s3563_s19 + $0x38] sm:$0xff] %v1026_v37   ;;  %2380 = vmatmul.mubr.bf16.gmra.mrb[12].mxu0 %v1026_v37 }
 0x200   : > { %2688 = shalt.err (!%p2685_p7)
}
 0x201   : > { %s2689_s26 = scalar_lea.hbm %s3892_s15, 2048  ;;  %s2693_s8 = scalar_lea.hbm %s4057_s6, 4096 }
 0x202   : > { %p2690_p9 = scmp.ne.s32.totalorder %s3892_s15, %s2689_s26  ;;  %p2694_p5 = scmp.lt.u32.totalorder %s3892_s15, %s4057_s6 }
 0x203   : > { %p2695_p11 = scmp.lt.u32.totalorder %s2693_s8, %s2689_s26  ;;  %p2697_p4 = scmp.lt.u32.totalorder %s2689_s26, %s3892_s15 }
 0x204   : > { %p2691_p1 = pnand %p2690_p9, %p2916_p12 }
 0x205   : > { %p2696_p2 = por %p2695_p11, %p2694_p5 }
 0x206   : > { %p2692_p0 = pneg %p2691_p1 }
 0x207   : > { %p2698_p6 = por %p2697_p4, %p2696_p2 }
 0x209   : > { %p2699_p8 = pnand %p2698_p6, %p2692_p0 }
 0x20b   : > { %2702 = shalt.err (!%p2699_p8)
}
 0x20c   : > { %s2784_s11 = smov 64   ;;  %s2785_s20 = smov 4   ;;  %v3927_v43 = vld [vmem:[%s4055_s4] ss:$0 sm:$0xff]  ;;  %v2297_v62 = vld [vmem:[%s2974_s7 + $0x8] sm:$0xff]   ;;  %v2299_v32 = vld [vmem:[%s2974_s7 + $0x18] sm:$0xff]  }
 0x20d   : > { %2422 = dma.vmem_to_hbm [thread:$0]  (%p2916_p12), %s3895_s16, 2048, %s3892_s15, %s1673_s18, %s2784_s11, %s2784_s11, %s2785_s20   ;;  %v2129_v27 = vunpack.c.l.bf16 %v2297_v62  ;;  %v2130_v34 = vunpack.c.h.bf16 %v2297_v62  ;;  %v2137_v20 = vunpack.c.l.bf16 %v2299_v32  ;;  %v2138_v26 = vunpack.c.h.bf16 %v2299_v32 }
 0x20e   : > { %v2124_v24 = vld [vmem:[%s2974_s7] sm:$0xff]   ;;  %v2305_v17 = vld [vmem:[%s2974_s7 + $0x48] sm:$0xff]   ;;  %s3942_s15 = scalar_lea.vmem [#allocation7], %s2970_s17  ;;  %v2298_v7 = vld [vmem:[%s2974_s7 + $0x10] sm:$0xff]   ;;  %s4000_s18 = scalar_lea.hbm %s4056_s5, %s1977_s10 }
 0x20f   : > { %v2304_v14 = vld [vmem:[%s2974_s7 + $0x40] sm:$0xff]   ;;  %v2125_v29 = vunpack.c.l.bf16 %v2124_v24  ;;  %v2126_v36 = vunpack.c.h.bf16 %v2124_v24  ;;  %v2161_v57 = vunpack.c.l.bf16 %v2305_v17  ;;  %v2162_v12 = vunpack.c.h.bf16 %v2305_v17  ;;  %v2307_v28 = vld [vmem:[%s2974_s7 + $0x58] sm:$0xff]   ;;  %v2306_v55 = vld [vmem:[%s2974_s7 + $0x50] sm:$0xff]   ;;  %s1686_s17 = sshll.u32 %s3942_s15, 4  ;;  %s1668_s30 = scalar_lea.sflag [#allocation4], %s2967_s12  ;;  %s4002_s17 = int_to_ptr.vmem [resolvable:$true] %s1686_s17 }
 0x210   : > { %v2157_v11 = vunpack.c.l.bf16 %v2304_v14  ;;  %v2158_v16 = vunpack.c.h.bf16 %v2304_v14  ;;  %v2133_v47 = vunpack.c.l.bf16 %v2298_v7  ;;  %v2134_v9 = vunpack.c.h.bf16 %v2298_v7  ;;  %s2703_s8 = scalar_lea.vmem %s4002_s17, 2048  ;;  %s2786_s27 = smov [#allocation7]  }
 0x211   : > { %v2169_v6 = vunpack.c.l.bf16 %v2307_v28  ;;  %v2165_v48 = vunpack.c.l.bf16 %v2306_v55  ;;  %v2170_v3 = vunpack.c.h.bf16 %v2307_v28  ;;  %v2166_v17 = vunpack.c.h.bf16 %v2306_v55  ;;  %p2704_p10 = scmp.ne.s32.totalorder %s4002_s17, %s2703_s8  ;;  %s2707_s25 = sshll.u32 %s2786_s27, 4  ;;  %s2708_s25 = int_to_ptr.vmem [resolvable:$false] %s2707_s25 }
 0x212   : > { %s2709_s29 = scalar_lea.vmem %s2708_s25, 4096  ;;  %p2710_p7 = scmp.lt.s32.totalorder %s4002_s17, %s2708_s25 }
 0x213   : > { %p2705_p13 = pnand %p2704_p10, %p2916_p12  ;;  %p2711_p9 = scmp.lt.s32.totalorder %s2709_s29, %s2703_s8 }
 0x215   : > { %p2706_p3 = pneg %p2705_p13  ;;  %p2712_p1 = por %p2711_p9, %p2710_p7 }
 0x217   : > { %p2713_p0 = pnand %p2712_p1, %p2706_p3 }
 0x2a3   : > { %v2369_v58 = vpop.f32.mrb[0].mxu0 }
 0x2a4   : > { %v1293_v50 = vadd.f32 %v2369_v58, %v3927_v43  ;;  %v1284_v45 = vpop.f32.mrb[1].mxu0 }
 0x2a5   : > { %v1285_v46 = vadd.f32 %v3927_v43, %v1284_v45  ;;  %v2370_v0 = vpop.f32.mrb[2].mxu0 }
 0x2a6   : > { %v1296_v41 = vadd.f32 %v2370_v0, %v3927_v43  ;;  %v1287_v63 = vpop.f32.mrb[3].mxu0  ;;  %v1477_v44 = vadd.f32 %v2129_v27, %v1293_v50 }
 0x2a7   : > { %v2385_v56 = vpop.f32.mrb[0].mxu1  ;;  %v1288_v35 = vadd.f32 %v3927_v43, %v1287_v63  ;;  %v1475_v61 = vadd.f32 %v2125_v29, %v1285_v46  ;;  %v2301_v29 = vld [vmem:[%s2974_s7 + $0x28] sm:$0xff]   ;;  %v2300_v63 = vld [vmem:[%s2974_s7 + $0x20] sm:$0xff]  }
 0x2a8   : > { %v1357_v59 = vadd.f32 %v2385_v56, %v3927_v43  ;;  %v1348_v2 = vpop.f32.mrb[1].mxu1  ;;  %v1478_v51 = vadd.f32 %v2130_v34, %v1296_v41 }
 0x2a9   : > { %v1349_v1 = vadd.f32 %v3927_v43, %v1348_v2  ;;  %v2386_v13 = vpop.f32.mrb[2].mxu1  ;;  %v1476_v54 = vadd.f32 %v2126_v36, %v1288_v35 }
 0x2aa   : > { %v1360_v5 = vadd.f32 %v2386_v13, %v3927_v43  ;;  %v1351_v15 = vpop.f32.mrb[3].mxu1  ;;  %v2195_v53 = vpack.c.bf16 %v1478_v51, %v1477_v44  ;;  %v1493_v10 = vadd.f32 %v2161_v57, %v1357_v59  ;;  %v2309_v59 = vld [vmem:[%s2974_s7 + $0x68] sm:$0xff]   ;;  %v2146_v51 = vunpack.c.h.bf16 %v2301_v29 }
 0x2ab   : > { %v1352_v31 = vadd.f32 %v3927_v43, %v1351_v15  ;;  %v2190_v33 = vpack.c.bf16 %v1476_v54, %v1475_v61  ;;  %v1491_v8 = vadd.f32 %v2157_v11, %v1349_v1  ;;  %v2308_v1 = vld [vmem:[%s2974_s7 + $0x60] sm:$0xff]   ;;  %v2141_v61 = vunpack.c.l.bf16 %v2300_v63 }
 0x2ac   : > { %v1494_v30 = vadd.f32 %v2162_v12, %v1360_v5  ;;  %2312 = vst [vmem:[%s3942_s15 + $0x8] sm:$0xff] %v2195_v53   ;;  %v2145_v12 = vunpack.c.l.bf16 %v2301_v29  ;;  %v2142_v5 = vunpack.c.h.bf16 %v2300_v63  ;;  %v2174_v7 = vunpack.c.h.bf16 %v2308_v1 }
 0x2ad   : > { %v1492_v19 = vadd.f32 %v2158_v16, %v1352_v31  ;;  %2191 = vst [vmem:[%s3942_s15] sm:$0xff] %v2190_v33  }
 0x2ae   : > { %v2235_v60 = vpack.c.bf16 %v1494_v30, %v1493_v10  ;;  %v2177_v10 = vunpack.c.l.bf16 %v2309_v59 }
 0x2af   : > { %v2230_v38 = vpack.c.bf16 %v1492_v19, %v1491_v8  ;;  %v2178_v8 = vunpack.c.h.bf16 %v2309_v59 }
 0x2b0   : > { %2320 = vst [vmem:[%s3942_s15 + $0x48] sm:$0xff] %v2235_v60  }
 0x2b1   : > { %2319 = vst [vmem:[%s3942_s15 + $0x40] sm:$0xff] %v2230_v38   ;;  %v2173_v38 = vunpack.c.l.bf16 %v2308_v1 }
 0x2bc   : > { %v2373_v4 = vpop.f32.mrb[4].mxu0 }
 0x2bd   : > { %v1309_v18 = vadd.f32 %v2373_v4, %v3927_v43  ;;  %v1300_v23 = vpop.f32.mrb[5].mxu0 }
 0x2be   : > { %v1301_v49 = vadd.f32 %v3927_v43, %v1300_v23  ;;  %v2374_v22 = vpop.f32.mrb[6].mxu0 }
 0x2bf   : > { %v1312_v21 = vadd.f32 %v2374_v22, %v3927_v43  ;;  %v1303_v39 = vpop.f32.mrb[7].mxu0  ;;  %v2389_v25 = vpop.f32.mrb[4].mxu1  ;;  %v1481_v37 = vadd.f32 %v2137_v20, %v1309_v18 }
 0x2c0   : > { %v1304_v52 = vadd.f32 %v3927_v43, %v1303_v39  ;;  %v1373_v42 = vadd.f32 %v2389_v25, %v3927_v43  ;;  %v1364_v40 = vpop.f32.mrb[5].mxu1  ;;  %v1479_v50 = vadd.f32 %v2133_v47, %v1301_v49 }
 0x2c1   : > { %v1482_v62 = vadd.f32 %v2138_v26, %v1312_v21  ;;  %v1365_v24 = vadd.f32 %v3927_v43, %v1364_v40  ;;  %v2390_v58 = vpop.f32.mrb[6].mxu1  ;;  %v2303_v40 = vld [vmem:[%s2974_s7 + $0x38] sm:$0xff]  }
 0x2c2   : > { %v1480_v27 = vadd.f32 %v2134_v9, %v1304_v52  ;;  %v1376_v45 = vadd.f32 %v2390_v58, %v3927_v43  ;;  %v1367_v34 = vpop.f32.mrb[7].mxu1  ;;  %v1497_v36 = vadd.f32 %v2169_v6, %v1373_v42  ;;  %v2311_v6 = vld [vmem:[%s2974_s7 + $0x78] sm:$0xff]   ;;  %v2310_v42 = vld [vmem:[%s2974_s7 + $0x70] sm:$0xff]   ;;  %v2154_v63 = vunpack.c.h.bf16 %v2303_v40 }
 0x2c3   : > { %v2205_v14 = vpack.c.bf16 %v1482_v62, %v1481_v37  ;;  %v1368_v46 = vadd.f32 %v3927_v43, %v1367_v34  ;;  %v1495_v56 = vadd.f32 %v2165_v48, %v1365_v24  ;;  %v2185_v62 = vunpack.c.l.bf16 %v2311_v6 }
 0x2c4   : > { %v2200_v0 = vpack.c.bf16 %v1480_v27, %v1479_v50  ;;  %v1498_v41 = vadd.f32 %v2170_v3, %v1376_v45  ;;  %v2302_v3 = vld [vmem:[%s2974_s7 + $0x30] sm:$0xff]   ;;  %v2186_v58 = vunpack.c.h.bf16 %v2311_v6  ;;  %v2181_v50 = vunpack.c.l.bf16 %v2310_v42 }
 0x2c5   : > { %2314 = vst [vmem:[%s3942_s15 + $0x18] sm:$0xff] %v2205_v14   ;;  %v1496_v57 = vadd.f32 %v2166_v17, %v1368_v46  ;;  %v2377_v35 = vpop.f32.mrb[8].mxu0  ;;  %v2182_v45 = vunpack.c.h.bf16 %v2310_v42  ;;  %v2153_v14 = vunpack.c.l.bf16 %v2303_v40  ;;  %v2150_v59 = vunpack.c.h.bf16 %v2302_v3 }
 0x2c6   : > { %2313 = vst [vmem:[%s3942_s15 + $0x10] sm:$0xff] %v2200_v0   ;;  %v2245_v2 = vpack.c.bf16 %v1498_v41, %v1497_v36  ;;  %v1325_v11 = vadd.f32 %v2377_v35, %v3927_v43  ;;  %v1316_v44 = vpop.f32.mrb[9].mxu0  ;;  %v2149_v41 = vunpack.c.l.bf16 %v2302_v3 }
 0x2c7   : > { %v2240_v13 = vpack.c.bf16 %v1496_v57, %v1495_v56  ;;  %v1317_v16 = vadd.f32 %v3927_v43, %v1316_v44  ;;  %v2378_v54 = vpop.f32.mrb[10].mxu0  ;;  %v2393_v15 = vpop.f32.mrb[8].mxu1 }
 0x2c8   : > { %2322 = vst [vmem:[%s3942_s15 + $0x58] sm:$0xff] %v2245_v2   ;;  %v1328_v53 = vadd.f32 %v2378_v54, %v3927_v43  ;;  %v1319_v31 = vpop.f32.mrb[11].mxu0  ;;  %v1389_v33 = vadd.f32 %v2393_v15, %v3927_v43  ;;  %v1380_v30 = vpop.f32.mrb[9].mxu1  ;;  %v1485_v4 = vadd.f32 %v2145_v12, %v1325_v11 }
 0x2c9   : > { %2321 = vst [vmem:[%s3942_s15 + $0x50] sm:$0xff] %v2240_v13   ;;  %v1320_v19 = vadd.f32 %v3927_v43, %v1319_v31  ;;  %v1381_v60 = vadd.f32 %v3927_v43, %v1380_v30  ;;  %v2394_v32 = vpop.f32.mrb[10].mxu1  ;;  %v1483_v23 = vadd.f32 %v2141_v61, %v1317_v16 }
 0x2ca   : > { %v1486_v28 = vadd.f32 %v2146_v51, %v1328_v53  ;;  %v1392_v18 = vadd.f32 %v2394_v32, %v3927_v43  ;;  %v1383_v20 = vpop.f32.mrb[11].mxu1  ;;  %v1501_v47 = vadd.f32 %v2177_v10, %v1389_v33 }
 0x2cb   : > { %v1484_v26 = vadd.f32 %v2142_v5, %v1320_v19  ;;  %v1384_v55 = vadd.f32 %v3927_v43, %v1383_v20  ;;  %v1499_v21 = vadd.f32 %v2173_v38, %v1381_v60 }
 0x2cc   : > { %v2215_v49 = vpack.c.bf16 %v1486_v28, %v1485_v4  ;;  %v1502_v22 = vadd.f32 %v2178_v8, %v1392_v18 }
 0x2cd   : > { %v2210_v9 = vpack.c.bf16 %v1484_v26, %v1483_v23  ;;  %v1500_v39 = vadd.f32 %v2174_v7, %v1384_v55 }
 0x2ce   : > { %2316 = vst [vmem:[%s3942_s15 + $0x28] sm:$0xff] %v2215_v49   ;;  %v2255_v25 = vpack.c.bf16 %v1502_v22, %v1501_v47 }
 0x2cf   : > { %2315 = vst [vmem:[%s3942_s15 + $0x20] sm:$0xff] %v2210_v9   ;;  %v2250_v52 = vpack.c.bf16 %v1500_v39, %v1499_v21 }
 0x2d0   : > { %2324 = vst [vmem:[%s3942_s15 + $0x68] sm:$0xff] %v2255_v25   ;;  %v2397_v48 = vpop.f32.mrb[12].mxu1 }
 0x2d1   : > { %2323 = vst [vmem:[%s3942_s15 + $0x60] sm:$0xff] %v2250_v52   ;;  %v1405_v37 = vadd.f32 %v2397_v48, %v3927_v43  ;;  %v1396_v24 = vpop.f32.mrb[13].mxu1 }
 0x2d2   : > { %v1397_v17 = vadd.f32 %v3927_v43, %v1396_v24  ;;  %v2398_v27 = vpop.f32.mrb[14].mxu1  ;;  %v2381_v34 = vpop.f32.mrb[12].mxu0 }
 0x2d3   : > { %v1408_v46 = vadd.f32 %v2398_v27, %v3927_v43  ;;  %v1399_v29 = vpop.f32.mrb[15].mxu1  ;;  %v1341_v0 = vadd.f32 %v2381_v34, %v3927_v43  ;;  %v1332_v36 = vpop.f32.mrb[13].mxu0  ;;  %v1505_v2 = vadd.f32 %v2185_v62, %v1405_v37 }
 0x2d4   : > { %v1400_v56 = vadd.f32 %v3927_v43, %v1399_v29  ;;  %v1333_v57 = vadd.f32 %v3927_v43, %v1332_v36  ;;  %v2382_v35 = vpop.f32.mrb[14].mxu0  ;;  %v1503_v51 = vadd.f32 %v2181_v50, %v1397_v17 }
 0x2d5   : > { %v1506_v11 = vadd.f32 %v2186_v58, %v1408_v46  ;;  %v1344_v12 = vadd.f32 %v2382_v35, %v3927_v43  ;;  %v1335_v44 = vpop.f32.mrb[15].mxu0  ;;  %v1489_v61 = vadd.f32 %v2153_v14, %v1341_v0 }
 0x2d6   : > { %v1504_v1 = vadd.f32 %v2182_v45, %v1400_v56  ;;  %v1336_v13 = vadd.f32 %v3927_v43, %v1335_v44  ;;  %v1487_v15 = vadd.f32 %v2149_v41, %v1333_v57 }
 0x2d7   : > { %v2265_v16 = vpack.c.bf16 %v1506_v11, %v1505_v2  ;;  %v1490_v54 = vadd.f32 %v2154_v63, %v1344_v12 }
 0x2d8   : > { %v2260_v5 = vpack.c.bf16 %v1504_v1, %v1503_v51  ;;  %v1488_v53 = vadd.f32 %v2150_v59, %v1336_v13 }
 0x2d9   : > { %2326 = vst [vmem:[%s3942_s15 + $0x78] sm:$0xff] %v2265_v16   ;;  %v2225_v31 = vpack.c.bf16 %v1490_v54, %v1489_v61 }
 0x2da   : > { %2325 = vst [vmem:[%s3942_s15 + $0x70] sm:$0xff] %v2260_v5   ;;  %v2220_v33 = vpack.c.bf16 %v1488_v53, %v1487_v15 }
 0x2db   : > { %2318 = vst [vmem:[%s3942_s15 + $0x38] sm:$0xff] %v2225_v31  }
 0x2dc   : > { %2317 = vst [vmem:[%s3942_s15 + $0x30] sm:$0xff] %v2220_v33  }
 0x2dd   : > { %2716 = shalt.err (!%p2713_p0)
}
 0x2de   : > { %s2717_s10 = scalar_lea.hbm %s4000_s18, 2048  ;;  %s2721_s15 = scalar_lea.hbm %s4056_s5, 4096 }
 0x2df   : > { %p2718_p5 = scmp.ne.s32.totalorder %s4000_s18, %s2717_s10  ;;  %p2722_p4 = scmp.lt.u32.totalorder %s4000_s18, %s4056_s5 }
 0x2e0   : > { %p2723_p6 = scmp.lt.u32.totalorder %s2721_s15, %s2717_s10  ;;  %p2725_p10 = scmp.lt.u32.totalorder %s2717_s10, %s4000_s18 }
 0x2e1   : > { %p2719_p11 = pnand %p2718_p5, %p2916_p12 }
 0x2e2   : > { %p2724_p8 = por %p2723_p6, %p2722_p4 }
 0x2e3   : > { %p2720_p2 = pneg %p2719_p11 }
 0x2e4   : > { %p2726_p13 = por %p2725_p10, %p2724_p8 }
 0x2e6   : > { %p2727_p3 = pnand %p2726_p13, %p2720_p2 }
 0x2e8   : > { %2730 = shalt.err (!%p2727_p3)
}
 0x2e9   : > { %2421 = dma.vmem_to_hbm [thread:$0]  (%p2916_p12), %s4002_s17, 2048, %s4000_s18, %s1668_s30, %s2784_s11, %s2784_s11, %s2785_s20  }
 0x2ea PF: > { %s1717_s8 = sand.u32 1, %s2765_s21   ;;  %p4104_p7 = scmp.ne.s32.totalorder %s4072_s28, 0 }
 0x2eb   : > { %p4105_p9 = scmp.ge.s32.totalorder %s2777_s24, 2  ;;  %s1718_s27 = scalar_lea.sflag [#allocation4], %s1717_s8 }
 0x2ed   : > { %p2434_p1 = pnand %p4105_p9, %p4104_p7 }
 0x2ef   : > { %2756 = dma.done.wait (!%p2434_p1), %s1718_s27, 2048  }
 0x2f0   : > { %2758 = vsyncadd (!%p2434_p1), %s1718_s27, 4294965248  ;;  %s1727_s14 = scalar_lea.sflag [#allocation9], %s1717_s8 }
 0x2f1   : > { %2760 = dma.done.wait (!%p2434_p1), %s1727_s14, 2048  }
 0x2f2   : > { %2762 = vsyncadd (!%p2434_p1), %s1727_s14, 4294965248  ;;  %p24_p12 = scmp.ge.s32.totalorder %s2878_s9, 4   ;;  %s4106_s21 = smov %s2769_s22 }
 0x2f3   : > { %s4107_s22 = smov %s2773_s23  ;;  %s4108_s23 = smov %s2912_s13 }
 0x2f4   : > { %s4109_s24 = smov %s2878_s9  ;;  %26 = sbr.rel (!%p24_p12) target bundleno = 8 (0x8), region = 106 }
 0x2fb   :  { %1732 = vsyncpa [#allocation3], 1 }
 0x2fc   :  { %1734 = vsyncpa [#allocation3 + $0x1], 1 }
 0x2fd   :  { %1735 = vsyncpa [#allocation6], 1 }
 0x2fe   :  { %1736 = vsyncpa [#allocation4], 1 }
 0x2ff   :  { %1738 = vsyncpa [#allocation4 + $0x1], 1 }
 0x300   :  { %1739 = vsyncpa [#allocation9], 1 }
 0x301   :  { %1741 = vsyncpa [#allocation9 + $0x1], 1 }

</bundles_post_ra>
